<compile_context>
chip_gen: v7x
topology: tpu7x:2x2x1
jax: 0.10.0
libtpu: 0.0.40
codegen_flags: <defaults>
</compile_context>

<pallas_src>
import functools

import jax
import jax.numpy as jnp
from jax.experimental import pallas as pl
from jax.experimental.pallas import tpu as pltpu


LANE = 128
SUBLANE = 8
MAX_BATCH_BLOCK = 32   # L=8 -> 256-row MXU LHS on v6e/v7x; 2 clean passes on v5e


def _round_up(x, m):
    return (x + m - 1) // m * m


# --------------------------- fused forward kernel ---------------------------
def _causal_kernel(u_ref, gamma_ref, beta_ref, a_ref, Bm_ref, Cm_ref, Dv_ref,
                   w1_ref, b1_ref, w2_ref, b2_ref, w3_ref, b3_ref, out_ref,
                   *, d_real, num_layers):
    """Full CausalModel forward for one batch block.

    u_ref:   (L, Bblk, Dp)  concatenated [embedding | signals], time-major,
                            zero-padded to Dp = 128 lanes.
    gamma/beta/Dv_ref: (NL, 1, Dp) f32   per-layer LN scale/shift, skip vector
    a_ref:   (NL, 1, Pp) f32             diagonal transition (0 in padded lanes)
    Bm_ref:  (NL, Dp, Pp) bf16           input projections
    Cm_ref:  (NL, Pp, Dp) bf16           output projections
    w1_ref:  (Dp, H1p) bf16              heads fused along columns (256 lanes)
    w2_ref:  (H1p, H2p) bf16             block-diagonal per-head layer 2
    w3_ref:  (H2p, Op) bf16              block-diagonal per-head readout
    b*_ref:  f32 biases
    out_ref: (Bblk, Op) f32              lane-dense; [:, :H] are the heads
    """
    u = u_ref[...]                                   # (L, Bblk, Dp) f32
    L, Bblk, Dp = u.shape
    Pp = a_ref.shape[-1]

    inv_d = jnp.float32(1.0 / d_real)
    # Lane-validity mask: padded feature lanes must not pollute the two-pass
    # LayerNorm variance.
    lane_idx = jax.lax.broadcasted_iota(jnp.int32, (1, 1, Dp), 2)
    feat_mask = (lane_idx < d_real).astype(jnp.float32)

    n_levels = max(1, (L - 1).bit_length())          # ceil(log2(L))

    feat = None
    for l in range(num_layers):                      # static unroll (3 layers)
        # ---- pre-LayerNorm (two-pass, masked) over the d_real real features.
        mean = jnp.sum(u, axis=-1, keepdims=True) * inv_d
        xc = (u - mean) * feat_mask
        var = jnp.sum(xc * xc, axis=-1, keepdims=True) * inv_d
        x = xc * jax.lax.rsqrt(var + 1e-5)
        x = x * gamma_ref[l] + beta_ref[l]           # (L, Bblk, Dp)

        # ---- input projection on the MXU (bf16 in, f32 accumulate)
        bu = jnp.dot(x.astype(jnp.bfloat16).reshape(L * Bblk, Dp), Bm_ref[l],
                     preferred_element_type=jnp.float32)
        h = bu.reshape(L, Bblk, Pp)

        # ---- diagonal recurrence h_t = a*h_{t-1} + bu_t as a log-depth scan
        #      over full (L, Bblk, Pp) blocks (Hillis-Steele with decay a).
        #      The shift along the leading (time) axis is pure vreg
        #      re-indexing; negligible at L=8.
        # TODO(synk): for long L switch to a chunked scan (serial carry across
        # 8-step chunks) and time-axis grid chunking to stay within v7x VMEM.
        apow = a_ref[l]                              # (1, Pp)
        for dlev in range(n_levels):
            shift = 1 << dlev
            if shift >= L:
                break
            h_prev = jnp.concatenate(
                [jnp.zeros((shift, Bblk, Pp), jnp.float32), h[:L - shift]],
                axis=0)
            h = h + apow * h_prev
            apow = apow * apow

        if l < num_layers - 1:
            # ---- full-sequence output projection + skip + GELU + residual
            y = jnp.dot(h.astype(jnp.bfloat16).reshape(L * Bblk, Pp), Cm_ref[l],
                        preferred_element_type=jnp.float32).reshape(L, Bblk, Dp)
            y = y + x * Dv_ref[l]
            u = u + jax.nn.gelu(y, approximate=True)
        else:
            # ---- last layer: only the final timestep feeds the heads
            y = jnp.dot(h[L - 1].astype(jnp.bfloat16), Cm_ref[l],
                        preferred_element_type=jnp.float32)       # (Bblk, Dp)
            y = y + x[L - 1] * Dv_ref[l]
            feat = u[L - 1] + jax.nn.gelu(y, approximate=True)    # (Bblk, Dp)

    # ---- fused control-variate heads: D -> 256 -> H2p -> 128 (one lane/head)
    h1 = jnp.maximum(
        jnp.dot(feat.astype(jnp.bfloat16), w1_ref[...],
                preferred_element_type=jnp.float32) + b1_ref[...], 0.0)
    h2 = jnp.maximum(
        jnp.dot(h1.astype(jnp.bfloat16), w2_ref[...],
                preferred_element_type=jnp.float32) + b2_ref[...], 0.0)
    out = jnp.dot(h2.astype(jnp.bfloat16), w3_ref[...],
                  preferred_element_type=jnp.float32) + b3_ref[...]
    out_ref[...] = out                                # lane-dense (Bblk, 128)


# ----------------------- parameter packing (init time) -----------------------
def _pack_params(params):
    """Pad / stack / bf16-cast raw parameters into the fused-kernel layout.

    Called ONCE by make_causal_forward; never on the per-call path.
    """
    layers = params["s5_layers"]
    nl = len(layers)
    d = layers[0]["gamma"].shape[-1]
    p = layers[0]["a"].shape[-1]
    dp = _round_up(d, LANE)
    pp = _round_up(p, LANE)

    def pad_row(v, width):
        return jnp.pad(v, ((0, 0), (0, width - v.shape[-1])))

    gamma = jnp.stack([pad_row(lp["gamma"], dp) for lp in layers])   # (NL,1,Dp)
    beta = jnp.stack([pad_row(lp["beta"], dp) for lp in layers])
    a = jnp.stack([pad_row(lp["a"], pp) for lp in layers])           # (NL,1,Pp)
    Dv = jnp.stack([pad_row(lp["D"], dp) for lp in layers])
    Bm = jnp.stack([jnp.pad(lp["B"], ((0, dp - d), (0, pp - p)))
                    for lp in layers]).astype(jnp.bfloat16)          # (NL,Dp,Pp)
    Cm = jnp.stack([jnp.pad(lp["C"], ((0, pp - p), (0, dp - d)))
                    for lp in layers]).astype(jnp.bfloat16)          # (NL,Pp,Dp)

    hp = params["heads"]
    H, _, h1 = hp["w1"].shape
    h2 = hp["w2"].shape[-1]
    H1 = H * h1
    H1p = _round_up(H1, LANE)        # 192 -> 256: unmasked vregs, clean MXU pass
    H2p = _round_up(H * h2, LANE)
    Op = LANE

    # layer 1: heads concatenated along columns -> one matmul (padded to H1p)
    w1 = jnp.pad(jnp.transpose(hp["w1"], (1, 0, 2)).reshape(d, H1),
                 ((0, dp - d), (0, H1p - H1))).astype(jnp.bfloat16)  # (Dp,H1p)
    b1 = jnp.pad(hp["b1"].reshape(1, H1), ((0, 0), (0, H1p - H1)))
    # layer 2: block-diagonal (head i: rows i*h1.., cols i*h2..)
    w2 = jnp.zeros((H1p, H2p), jnp.float32)
    b2 = jnp.zeros((1, H2p), jnp.float32)
    for i in range(H):
        w2 = w2.at[i * h1:(i + 1) * h1, i * h2:(i + 1) * h2].set(hp["w2"][i])
        b2 = b2.at[0, i * h2:(i + 1) * h2].set(hp["b2"][i, 0])
    w2 = w2.astype(jnp.bfloat16)
    # layer 3: block-diagonal readout, one output lane per head
    w3 = jnp.zeros((H2p, Op), jnp.float32)
    b3 = jnp.zeros((1, Op), jnp.float32)
    for i in range(H):
        w3 = w3.at[i * h2:(i + 1) * h2, i].set(hp["w3"][i, :, 0])
        b3 = b3.at[0, i].set(hp["b3"][i, 0, 0])
    w3 = w3.astype(jnp.bfloat16)

    dims = dict(d=d, dp=dp, pp=pp, H=H, H1p=H1p, H2p=H2p, Op=Op, nl=nl)
    packed = dict(gamma=gamma, beta=beta, a=a, Bm=Bm, Cm=Cm, Dv=Dv,
                  w1=w1, b1=b1, w2=w2, b2=b2, w3=w3, b3=b3)
    return packed, dims


# ------------------------------- forward factory ------------------------------
def make_causal_forward(params, *, max_batch_block=MAX_BATCH_BLOCK):
    """Pack parameters once; return a jitted forward(op_x, input_signals).

    forward returns (B, num_control_variates) — matches CausalModel.forward(),
    which keeps only the last timestep of every head.
    """
    packed, dims = _pack_params(params)                 # once, at init
    weights = dict(packed, emb=params["embedding"].astype(jnp.float32))

    d, dp, pp = dims["d"], dims["dp"], dims["pp"]
    H, H1p, H2p, Op, nl = dims["H"], dims["H1p"], dims["H2p"], dims["Op"], dims["nl"]

    def forward(w, op_x, input_signals):
        # Glue (embedding gather, concat, pad) is tiny and fused by XLA.
        emb = w["emb"][op_x]                                      # (B, L, E)
        x = jnp.concatenate([emb, input_signals.astype(jnp.float32)], axis=-1)
        B, L, _ = x.shape

        # Fill the MXU row dim (L*Bblk) up to 256 when the real batch allows;
        # otherwise the smallest sublane-aligned block (no wasted zero rows).
        # Grid length >= 2 (v7x 2-TC sharding) falls out once B >= 2*Bblk.
        Bblk = min(max_batch_block, _round_up(B, SUBLANE))
        Bp = _round_up(B, Bblk)

        # TODO(synk): at production L*B sizes, keep u0 at its real 20-lane
        # width in HBM (full-extent last-dim BlockSpec) and pad to 128 inside
        # the kernel to cut input DMA bytes ~6.4x.
        u0 = jnp.transpose(x, (1, 0, 2))                          # (L, B, D)
        u0 = jnp.pad(u0, ((0, 0), (0, Bp - B), (0, dp - d)))      # (L, Bp, Dp)

        kernel = functools.partial(_causal_kernel, d_real=d, num_layers=nl)

        operands = (u0, w["gamma"], w["beta"], w["a"], w["Bm"], w["Cm"],
                    w["Dv"], w["w1"], w["b1"], w["w2"], w["b2"], w["w3"],
                    w["b3"])
        cost = pl.CostEstimate(
            flops=Bp * (4 * nl * L * dp * pp
                        + 2 * (dp * H1p + H1p * H2p + H2p * Op)),
            transcendentals=nl * L * Bp * dp,
            bytes_accessed=sum(int(a.size) * a.dtype.itemsize for a in operands)
                           + Bp * Op * 4)

        out = pl.pallas_call(
            kernel,
            out_shape=jax.ShapeDtypeStruct((Bp, Op), jnp.float32),
            grid_spec=pltpu.PrefetchScalarGridSpec(
                num_scalar_prefetch=0,
                grid=(Bp // Bblk,),
                in_specs=[
                    pl.BlockSpec((L, Bblk, dp), lambda i: (0, i, 0)),    # u0
                    pl.BlockSpec((nl, 1, dp), lambda i: (0, 0, 0)),      # gamma
                    pl.BlockSpec((nl, 1, dp), lambda i: (0, 0, 0)),      # beta
                    pl.BlockSpec((nl, 1, pp), lambda i: (0, 0, 0)),      # a
                    pl.BlockSpec((nl, dp, pp), lambda i: (0, 0, 0)),     # B
                    pl.BlockSpec((nl, pp, dp), lambda i: (0, 0, 0)),     # C
                    pl.BlockSpec((nl, 1, dp), lambda i: (0, 0, 0)),      # D skip
                    pl.BlockSpec((dp, H1p), lambda i: (0, 0)),           # w1
                    pl.BlockSpec((1, H1p), lambda i: (0, 0)),            # b1
                    pl.BlockSpec((H1p, H2p), lambda i: (0, 0)),          # w2
                    pl.BlockSpec((1, H2p), lambda i: (0, 0)),            # b2
                    pl.BlockSpec((H2p, Op), lambda i: (0, 0)),           # w3
                    pl.BlockSpec((1, Op), lambda i: (0, 0)),             # b3
                ],
                out_specs=pl.BlockSpec((Bblk, Op), lambda i: (i, 0)),
            ),
            compiler_params=pltpu.CompilerParams(
                dimension_semantics=("parallel",)),
            cost_estimate=cost,
        )(*operands)

        return out[:B, :H]                                        # (B, H)

    fwd = jax.jit(forward)
    return functools.partial(fwd, weights)


# ---------------------------- deterministic init ------------------------------
def init_params(key, input_dim, control_dim, embedding_dim=16, state_dim=64,
                num_s5_layers=3, num_control_variates=3,
                fc_hidden_dims=(64, 32)):
    concat_dim = input_dim + embedding_dim
    keys = iter(jax.random.split(key, 64))
    nk = lambda: next(keys)

    params = {}
    params["embedding"] = jax.random.normal(
        nk(), (control_dim, embedding_dim), jnp.float32)

    layers = []
    for _ in range(num_s5_layers):
        layers.append({
            "gamma": jnp.ones((1, concat_dim), jnp.float32),
            "beta": jnp.zeros((1, concat_dim), jnp.float32),
            # stable diagonal transition in (0, 1)
            "a": jnp.exp(-jnp.linspace(0.05, 1.0, state_dim,
                                       dtype=jnp.float32)).reshape(1, state_dim),
            "B": jax.random.normal(nk(), (concat_dim, state_dim), jnp.float32)
                 / jnp.sqrt(jnp.float32(concat_dim)),
            "C": jax.random.normal(nk(), (state_dim, concat_dim), jnp.float32)
                 / jnp.sqrt(jnp.float32(state_dim)),
            "D": 0.1 * jax.random.normal(nk(), (1, concat_dim), jnp.float32),
        })
    params["s5_layers"] = layers

    h1, h2 = fc_hidden_dims
    H = num_control_variates
    params["heads"] = {
        "w1": jax.random.normal(nk(), (H, concat_dim, h1), jnp.float32)
              / jnp.sqrt(jnp.float32(concat_dim)),
        "b1": jnp.zeros((H, 1, h1), jnp.float32),
        "w2": jax.random.normal(nk(), (H, h1, h2), jnp.float32)
              / jnp.sqrt(jnp.float32(h1)),
        "b2": jnp.zeros((H, 1, h2), jnp.float32),
        "w3": jax.random.normal(nk(), (H, h2, 1), jnp.float32)
              / jnp.sqrt(jnp.float32(h2)),
        "b3": jnp.zeros((H, 1, 1), jnp.float32),
    }
    return params


if __name__ == "__main__":
    B, L = 2, 8
    input_dim, control_dim = 4, 10

    root = jax.random.PRNGKey(0)
    kp, kx, ks = jax.random.split(root, 3)

    params = init_params(kp, input_dim=input_dim, control_dim=control_dim)
    op_x = jax.random.randint(kx, (B, L), 0, control_dim, dtype=jnp.int32)
    input_signals = jax.random.normal(ks, (B, L, input_dim), jnp.float32)

    forward = make_causal_forward(params)        # packs params once, jits fwd
    out = jax.block_until_ready(forward(op_x, input_signals))
    out = jax.block_until_ready(forward(op_x, input_signals))  # cached compile

    assert out.shape == (B, 3), out.shape
    assert bool(jnp.all(jnp.isfinite(out)))
    print("KERNEL_OK")
</pallas_src>

<mosaic_0001>
module attributes {stable_mosaic.version = 11 : i64} {
  func.func @_causal_kernel(%arg0: i32, %arg1: memref<8x8x128xf32, #tpu.memory_space<vmem>>, %arg2: memref<3x1x128xf32, #tpu.memory_space<vmem>>, %arg3: memref<3x1x128xf32, #tpu.memory_space<vmem>>, %arg4: memref<3x1x128xf32, #tpu.memory_space<vmem>>, %arg5: memref<3x128x128xbf16, #tpu.memory_space<vmem>>, %arg6: memref<3x128x128xbf16, #tpu.memory_space<vmem>>, %arg7: memref<3x1x128xf32, #tpu.memory_space<vmem>>, %arg8: memref<128x256xbf16, #tpu.memory_space<vmem>>, %arg9: memref<1x256xf32, #tpu.memory_space<vmem>>, %arg10: memref<256x128xbf16, #tpu.memory_space<vmem>>, %arg11: memref<1x128xf32, #tpu.memory_space<vmem>>, %arg12: memref<128x128xbf16, #tpu.memory_space<vmem>>, %arg13: memref<1x128xf32, #tpu.memory_space<vmem>>, %arg14: memref<8x128xf32, #tpu.memory_space<vmem>>) attributes {dimension_semantics = [#tpu.dimension_semantics<parallel>], iteration_bounds = array<i64: 1>, scalar_prefetch = 0 : i64, scratch_operands = 0 : i64, tpu.core_type = #tpu.core_type<tc>, window_params = [{transform_indices = @transform_0, window_bounds = array<i64: 8, 8, 128>}, {pipeline_mode = #tpu.pipeline_mode<synchronous>, transform_indices = @transform_1, window_bounds = array<i64: 3, 1, 128>}, {pipeline_mode = #tpu.pipeline_mode<synchronous>, transform_indices = @transform_2, window_bounds = array<i64: 3, 1, 128>}, {pipeline_mode = #tpu.pipeline_mode<synchronous>, transform_indices = @transform_3, window_bounds = array<i64: 3, 1, 128>}, {pipeline_mode = #tpu.pipeline_mode<synchronous>, transform_indices = @transform_4, window_bounds = array<i64: 3, 128, 128>}, {pipeline_mode = #tpu.pipeline_mode<synchronous>, transform_indices = @transform_5, window_bounds = array<i64: 3, 128, 128>}, {pipeline_mode = #tpu.pipeline_mode<synchronous>, transform_indices = @transform_6, window_bounds = array<i64: 3, 1, 128>}, {pipeline_mode = #tpu.pipeline_mode<synchronous>, transform_indices = @transform_7, window_bounds = array<i64: 128, 256>}, {pipeline_mode = #tpu.pipeline_mode<synchronous>, transform_indices = @transform_8, window_bounds = array<i64: 1, 256>}, {pipeline_mode = #tpu.pipeline_mode<synchronous>, transform_indices = @transform_9, window_bounds = array<i64: 256, 128>}, {pipeline_mode = #tpu.pipeline_mode<synchronous>, transform_indices = @transform_10, window_bounds = array<i64: 1, 128>}, {pipeline_mode = #tpu.pipeline_mode<synchronous>, transform_indices = @transform_11, window_bounds = array<i64: 128, 128>}, {pipeline_mode = #tpu.pipeline_mode<synchronous>, transform_indices = @transform_12, window_bounds = array<i64: 1, 128>}, {transform_indices = @transform_13, window_bounds = array<i64: 8, 128>}]} {
    %c0 = arith.constant 0 : index
    %c0_0 = arith.constant 0 : index
    %c0_1 = arith.constant 0 : index
    %0 = vector.load %arg1[%c0, %c0_0, %c0_1] : memref<8x8x128xf32, #tpu.memory_space<vmem>>, vector<8x8x128xf32>
    %1 = tpu.iota {dimensions = array<i32: 2>} : vector<1x1x128xi32>
    %c20_i32 = arith.constant 20 : i32
    %2 = vector.broadcast %c20_i32 : i32 to vector<1x1x128xi32>
    %3 = arith.cmpi slt, %1, %2 : vector<1x1x128xi32>
    %4 = arith.extui %3 : vector<1x1x128xi1> to vector<1x1x128xi32>
    %5 = arith.sitofp %4 : vector<1x1x128xi32> to vector<1x1x128xf32>
    %cst = arith.constant dense<0.000000e+00> : vector<8x8xf32>
    %6 = vector.multi_reduction <add>, %0, %cst [2] : vector<8x8x128xf32> to vector<8x8xf32>
    %7 = vector.shape_cast %6 : vector<8x8xf32> to vector<8x8x1xf32>
    %cst_2 = arith.constant 5.000000e-02 : f32
    %8 = vector.broadcast %cst_2 : f32 to vector<8x8x1xf32>
    %9 = arith.mulf %7, %8 : vector<8x8x1xf32>
    %10 = vector.broadcast %9 : vector<8x8x1xf32> to vector<8x8x128xf32>
    %11 = arith.subf %0, %10 : vector<8x8x128xf32>
    %12 = vector.broadcast %5 : vector<1x1x128xf32> to vector<8x8x128xf32>
    %13 = arith.mulf %11, %12 : vector<8x8x128xf32>
    %14 = arith.mulf %13, %13 : vector<8x8x128xf32>
    %cst_3 = arith.constant dense<0.000000e+00> : vector<8x8xf32>
    %15 = vector.multi_reduction <add>, %14, %cst_3 [2] : vector<8x8x128xf32> to vector<8x8xf32>
    %16 = vector.shape_cast %15 : vector<8x8xf32> to vector<8x8x1xf32>
    %cst_4 = arith.constant 5.000000e-02 : f32
    %17 = vector.broadcast %cst_4 : f32 to vector<8x8x1xf32>
    %18 = arith.mulf %16, %17 : vector<8x8x1xf32>
    %cst_5 = arith.constant 9.99999974E-6 : f32
    %19 = vector.broadcast %cst_5 : f32 to vector<8x8x1xf32>
    %20 = arith.addf %18, %19 : vector<8x8x1xf32>
    %21 = math.rsqrt %20 : vector<8x8x1xf32>
    %22 = vector.broadcast %21 : vector<8x8x1xf32> to vector<8x8x128xf32>
    %23 = arith.mulf %13, %22 : vector<8x8x128xf32>
    %c0_6 = arith.constant 0 : index
    %c0_7 = arith.constant 0 : index
    %c0_8 = arith.constant 0 : index
    %24 = vector.load %arg2[%c0_6, %c0_7, %c0_8] : memref<3x1x128xf32, #tpu.memory_space<vmem>>, vector<1x1x128xf32>
    %25 = vector.shape_cast %24 : vector<1x1x128xf32> to vector<1x128xf32>
    %26 = vector.shape_cast %25 : vector<1x128xf32> to vector<1x1x128xf32>
    %27 = vector.broadcast %26 : vector<1x1x128xf32> to vector<8x8x128xf32>
    %28 = arith.mulf %23, %27 : vector<8x8x128xf32>
    %c0_9 = arith.constant 0 : index
    %c0_10 = arith.constant 0 : index
    %c0_11 = arith.constant 0 : index
    %29 = vector.load %arg3[%c0_9, %c0_10, %c0_11] : memref<3x1x128xf32, #tpu.memory_space<vmem>>, vector<1x1x128xf32>
    %30 = vector.shape_cast %29 : vector<1x1x128xf32> to vector<1x128xf32>
    %31 = vector.shape_cast %30 : vector<1x128xf32> to vector<1x1x128xf32>
    %32 = vector.broadcast %31 : vector<1x1x128xf32> to vector<8x8x128xf32>
    %33 = arith.addf %28, %32 : vector<8x8x128xf32>
    %34 = arith.truncf %33 : vector<8x8x128xf32> to vector<8x8x128xbf16>
    %35 = vector.shape_cast %34 : vector<8x8x128xbf16> to vector<64x128xbf16>
    %c0_12 = arith.constant 0 : index
    %c0_13 = arith.constant 0 : index
    %c0_14 = arith.constant 0 : index
    %36 = vector.load %arg5[%c0_12, %c0_13, %c0_14] : memref<3x128x128xbf16, #tpu.memory_space<vmem>>, vector<1x128x128xbf16>
    %37 = vector.shape_cast %36 : vector<1x128x128xbf16> to vector<128x128xbf16>
    %cst_15 = arith.constant dense<0.000000e+00> : vector<64x128xf32>
    %38 = tpu.matmul %35, %37, %cst_15 {dimension_numbers = #tpu.dot_dimension_numbers<[1], [0], [0], [1], [0, 0, 1, 1], [], []>} : vector<64x128xbf16>, vector<128x128xbf16>, vector<64x128xf32> -> vector<64x128xf32>
    %39 = vector.shape_cast %38 : vector<64x128xf32> to vector<8x8x128xf32>
    %c0_16 = arith.constant 0 : index
    %c0_17 = arith.constant 0 : index
    %c0_18 = arith.constant 0 : index
    %40 = vector.load %arg4[%c0_16, %c0_17, %c0_18] : memref<3x1x128xf32, #tpu.memory_space<vmem>>, vector<1x1x128xf32>
    %41 = vector.shape_cast %40 : vector<1x1x128xf32> to vector<1x128xf32>
    %cst_19 = arith.constant 0.000000e+00 : f32
    %42 = vector.broadcast %cst_19 : f32 to vector<1x8x128xf32>
    %43 = vector.extract_strided_slice %39 {offsets = [0, 0, 0], sizes = [7, 8, 128], strides = [1, 1, 1]} : vector<8x8x128xf32> to vector<7x8x128xf32>
    %44 = tpu.concatenate %42, %43 in 0 : vector<1x8x128xf32>, vector<7x8x128xf32> -> vector<8x8x128xf32>
    %45 = vector.shape_cast %41 : vector<1x128xf32> to vector<1x1x128xf32>
    %46 = vector.broadcast %45 : vector<1x1x128xf32> to vector<8x8x128xf32>
    %47 = arith.mulf %46, %44 : vector<8x8x128xf32>
    %48 = arith.addf %39, %47 : vector<8x8x128xf32>
    %49 = arith.mulf %41, %41 : vector<1x128xf32>
    %cst_20 = arith.constant 0.000000e+00 : f32
    %50 = vector.broadcast %cst_20 : f32 to vector<2x8x128xf32>
    %51 = vector.extract_strided_slice %48 {offsets = [0, 0, 0], sizes = [6, 8, 128], strides = [1, 1, 1]} : vector<8x8x128xf32> to vector<6x8x128xf32>
    %52 = tpu.concatenate %50, %51 in 0 : vector<2x8x128xf32>, vector<6x8x128xf32> -> vector<8x8x128xf32>
    %53 = vector.shape_cast %49 : vector<1x128xf32> to vector<1x1x128xf32>
    %54 = vector.broadcast %53 : vector<1x1x128xf32> to vector<8x8x128xf32>
    %55 = arith.mulf %54, %52 : vector<8x8x128xf32>
    %56 = arith.addf %48, %55 : vector<8x8x128xf32>
    %57 = arith.mulf %49, %49 : vector<1x128xf32>
    %cst_21 = arith.constant 0.000000e+00 : f32
    %58 = vector.broadcast %cst_21 : f32 to vector<4x8x128xf32>
    %59 = vector.extract_strided_slice %56 {offsets = [0, 0, 0], sizes = [4, 8, 128], strides = [1, 1, 1]} : vector<8x8x128xf32> to vector<4x8x128xf32>
    %60 = tpu.concatenate %58, %59 in 0 : vector<4x8x128xf32>, vector<4x8x128xf32> -> vector<8x8x128xf32>
    %61 = vector.shape_cast %57 : vector<1x128xf32> to vector<1x1x128xf32>
    %62 = vector.broadcast %61 : vector<1x1x128xf32> to vector<8x8x128xf32>
    %63 = arith.mulf %62, %60 : vector<8x8x128xf32>
    %64 = arith.addf %56, %63 : vector<8x8x128xf32>
    %65 = arith.truncf %64 : vector<8x8x128xf32> to vector<8x8x128xbf16>
    %66 = vector.shape_cast %65 : vector<8x8x128xbf16> to vector<64x128xbf16>
    %c0_22 = arith.constant 0 : index
    %c0_23 = arith.constant 0 : index
    %c0_24 = arith.constant 0 : index
    %67 = vector.load %arg6[%c0_22, %c0_23, %c0_24] : memref<3x128x128xbf16, #tpu.memory_space<vmem>>, vector<1x128x128xbf16>
    %68 = vector.shape_cast %67 : vector<1x128x128xbf16> to vector<128x128xbf16>
    %cst_25 = arith.constant dense<0.000000e+00> : vector<64x128xf32>
    %69 = tpu.matmul %66, %68, %cst_25 {dimension_numbers = #tpu.dot_dimension_numbers<[1], [0], [0], [1], [0, 0, 1, 1], [], []>} : vector<64x128xbf16>, vector<128x128xbf16>, vector<64x128xf32> -> vector<64x128xf32>
    %70 = vector.shape_cast %69 : vector<64x128xf32> to vector<8x8x128xf32>
    %c0_26 = arith.constant 0 : index
    %c0_27 = arith.constant 0 : index
    %c0_28 = arith.constant 0 : index
    %71 = vector.load %arg7[%c0_26, %c0_27, %c0_28] : memref<3x1x128xf32, #tpu.memory_space<vmem>>, vector<1x1x128xf32>
    %72 = vector.shape_cast %71 : vector<1x1x128xf32> to vector<1x128xf32>
    %73 = vector.shape_cast %72 : vector<1x128xf32> to vector<1x1x128xf32>
    %74 = vector.broadcast %73 : vector<1x1x128xf32> to vector<8x8x128xf32>
    %75 = arith.mulf %33, %74 : vector<8x8x128xf32>
    %76 = arith.addf %70, %75 : vector<8x8x128xf32>
    %77 = arith.mulf %76, %76 : vector<8x8x128xf32>
    %78 = arith.mulf %76, %77 : vector<8x8x128xf32>
    %cst_29 = arith.constant 4.471500e-02 : f32
    %79 = vector.broadcast %cst_29 : f32 to vector<8x8x128xf32>
    %80 = arith.mulf %79, %78 : vector<8x8x128xf32>
    %81 = arith.addf %76, %80 : vector<8x8x128xf32>
    %cst_30 = arith.constant 0.797884583 : f32
    %82 = vector.broadcast %cst_30 : f32 to vector<8x8x128xf32>
    %83 = arith.mulf %82, %81 : vector<8x8x128xf32>
    %84 = math.tanh %83 : vector<8x8x128xf32>
    %cst_31 = arith.constant 1.000000e+00 : f32
    %85 = vector.broadcast %cst_31 : f32 to vector<8x8x128xf32>
    %86 = arith.addf %85, %84 : vector<8x8x128xf32>
    %cst_32 = arith.constant 5.000000e-01 : f32
    %87 = vector.broadcast %cst_32 : f32 to vector<8x8x128xf32>
    %88 = arith.mulf %87, %86 : vector<8x8x128xf32>
    %89 = arith.mulf %76, %88 : vector<8x8x128xf32>
    %90 = arith.addf %0, %89 : vector<8x8x128xf32>
    %cst_33 = arith.constant dense<0.000000e+00> : vector<8x8xf32>
    %91 = vector.multi_reduction <add>, %90, %cst_33 [2] : vector<8x8x128xf32> to vector<8x8xf32>
    %92 = vector.shape_cast %91 : vector<8x8xf32> to vector<8x8x1xf32>
    %cst_34 = arith.constant 5.000000e-02 : f32
    %93 = vector.broadcast %cst_34 : f32 to vector<8x8x1xf32>
    %94 = arith.mulf %92, %93 : vector<8x8x1xf32>
    %95 = vector.broadcast %94 : vector<8x8x1xf32> to vector<8x8x128xf32>
    %96 = arith.subf %90, %95 : vector<8x8x128xf32>
    %97 = vector.broadcast %5 : vector<1x1x128xf32> to vector<8x8x128xf32>
    %98 = arith.mulf %96, %97 : vector<8x8x128xf32>
    %99 = arith.mulf %98, %98 : vector<8x8x128xf32>
    %cst_35 = arith.constant dense<0.000000e+00> : vector<8x8xf32>
    %100 = vector.multi_reduction <add>, %99, %cst_35 [2] : vector<8x8x128xf32> to vector<8x8xf32>
    %101 = vector.shape_cast %100 : vector<8x8xf32> to vector<8x8x1xf32>
    %cst_36 = arith.constant 5.000000e-02 : f32
    %102 = vector.broadcast %cst_36 : f32 to vector<8x8x1xf32>
    %103 = arith.mulf %101, %102 : vector<8x8x1xf32>
    %cst_37 = arith.constant 9.99999974E-6 : f32
    %104 = vector.broadcast %cst_37 : f32 to vector<8x8x1xf32>
    %105 = arith.addf %103, %104 : vector<8x8x1xf32>
    %106 = math.rsqrt %105 : vector<8x8x1xf32>
    %107 = vector.broadcast %106 : vector<8x8x1xf32> to vector<8x8x128xf32>
    %108 = arith.mulf %98, %107 : vector<8x8x128xf32>
    %c1 = arith.constant 1 : index
    %c0_38 = arith.constant 0 : index
    %c0_39 = arith.constant 0 : index
    %109 = vector.load %arg2[%c1, %c0_38, %c0_39] : memref<3x1x128xf32, #tpu.memory_space<vmem>>, vector<1x1x128xf32>
    %110 = vector.shape_cast %109 : vector<1x1x128xf32> to vector<1x128xf32>
    %111 = vector.shape_cast %110 : vector<1x128xf32> to vector<1x1x128xf32>
    %112 = vector.broadcast %111 : vector<1x1x128xf32> to vector<8x8x128xf32>
    %113 = arith.mulf %108, %112 : vector<8x8x128xf32>
    %c1_40 = arith.constant 1 : index
    %c0_41 = arith.constant 0 : index
    %c0_42 = arith.constant 0 : index
    %114 = vector.load %arg3[%c1_40, %c0_41, %c0_42] : memref<3x1x128xf32, #tpu.memory_space<vmem>>, vector<1x1x128xf32>
    %115 = vector.shape_cast %114 : vector<1x1x128xf32> to vector<1x128xf32>
    %116 = vector.shape_cast %115 : vector<1x128xf32> to vector<1x1x128xf32>
    %117 = vector.broadcast %116 : vector<1x1x128xf32> to vector<8x8x128xf32>
    %118 = arith.addf %113, %117 : vector<8x8x128xf32>
    %119 = arith.truncf %118 : vector<8x8x128xf32> to vector<8x8x128xbf16>
    %120 = vector.shape_cast %119 : vector<8x8x128xbf16> to vector<64x128xbf16>
    %c1_43 = arith.constant 1 : index
    %c0_44 = arith.constant 0 : index
    %c0_45 = arith.constant 0 : index
    %121 = vector.load %arg5[%c1_43, %c0_44, %c0_45] : memref<3x128x128xbf16, #tpu.memory_space<vmem>>, vector<1x128x128xbf16>
    %122 = vector.shape_cast %121 : vector<1x128x128xbf16> to vector<128x128xbf16>
    %cst_46 = arith.constant dense<0.000000e+00> : vector<64x128xf32>
    %123 = tpu.matmul %120, %122, %cst_46 {dimension_numbers = #tpu.dot_dimension_numbers<[1], [0], [0], [1], [0, 0, 1, 1], [], []>} : vector<64x128xbf16>, vector<128x128xbf16>, vector<64x128xf32> -> vector<64x128xf32>
    %124 = vector.shape_cast %123 : vector<64x128xf32> to vector<8x8x128xf32>
    %c1_47 = arith.constant 1 : index
    %c0_48 = arith.constant 0 : index
    %c0_49 = arith.constant 0 : index
    %125 = vector.load %arg4[%c1_47, %c0_48, %c0_49] : memref<3x1x128xf32, #tpu.memory_space<vmem>>, vector<1x1x128xf32>
    %126 = vector.shape_cast %125 : vector<1x1x128xf32> to vector<1x128xf32>
    %cst_50 = arith.constant 0.000000e+00 : f32
    %127 = vector.broadcast %cst_50 : f32 to vector<1x8x128xf32>
    %128 = vector.extract_strided_slice %124 {offsets = [0, 0, 0], sizes = [7, 8, 128], strides = [1, 1, 1]} : vector<8x8x128xf32> to vector<7x8x128xf32>
    %129 = tpu.concatenate %127, %128 in 0 : vector<1x8x128xf32>, vector<7x8x128xf32> -> vector<8x8x128xf32>
    %130 = vector.shape_cast %126 : vector<1x128xf32> to vector<1x1x128xf32>
    %131 = vector.broadcast %130 : vector<1x1x128xf32> to vector<8x8x128xf32>
    %132 = arith.mulf %131, %129 : vector<8x8x128xf32>
    %133 = arith.addf %124, %132 : vector<8x8x128xf32>
    %134 = arith.mulf %126, %126 : vector<1x128xf32>
    %cst_51 = arith.constant 0.000000e+00 : f32
    %135 = vector.broadcast %cst_51 : f32 to vector<2x8x128xf32>
    %136 = vector.extract_strided_slice %133 {offsets = [0, 0, 0], sizes = [6, 8, 128], strides = [1, 1, 1]} : vector<8x8x128xf32> to vector<6x8x128xf32>
    %137 = tpu.concatenate %135, %136 in 0 : vector<2x8x128xf32>, vector<6x8x128xf32> -> vector<8x8x128xf32>
    %138 = vector.shape_cast %134 : vector<1x128xf32> to vector<1x1x128xf32>
    %139 = vector.broadcast %138 : vector<1x1x128xf32> to vector<8x8x128xf32>
    %140 = arith.mulf %139, %137 : vector<8x8x128xf32>
    %141 = arith.addf %133, %140 : vector<8x8x128xf32>
    %142 = arith.mulf %134, %134 : vector<1x128xf32>
    %cst_52 = arith.constant 0.000000e+00 : f32
    %143 = vector.broadcast %cst_52 : f32 to vector<4x8x128xf32>
    %144 = vector.extract_strided_slice %141 {offsets = [0, 0, 0], sizes = [4, 8, 128], strides = [1, 1, 1]} : vector<8x8x128xf32> to vector<4x8x128xf32>
    %145 = tpu.concatenate %143, %144 in 0 : vector<4x8x128xf32>, vector<4x8x128xf32> -> vector<8x8x128xf32>
    %146 = vector.shape_cast %142 : vector<1x128xf32> to vector<1x1x128xf32>
    %147 = vector.broadcast %146 : vector<1x1x128xf32> to vector<8x8x128xf32>
    %148 = arith.mulf %147, %145 : vector<8x8x128xf32>
    %149 = arith.addf %141, %148 : vector<8x8x128xf32>
    %150 = arith.truncf %149 : vector<8x8x128xf32> to vector<8x8x128xbf16>
    %151 = vector.shape_cast %150 : vector<8x8x128xbf16> to vector<64x128xbf16>
    %c1_53 = arith.constant 1 : index
    %c0_54 = arith.constant 0 : index
    %c0_55 = arith.constant 0 : index
    %152 = vector.load %arg6[%c1_53, %c0_54, %c0_55] : memref<3x128x128xbf16, #tpu.memory_space<vmem>>, vector<1x128x128xbf16>
    %153 = vector.shape_cast %152 : vector<1x128x128xbf16> to vector<128x128xbf16>
    %cst_56 = arith.constant dense<0.000000e+00> : vector<64x128xf32>
    %154 = tpu.matmul %151, %153, %cst_56 {dimension_numbers = #tpu.dot_dimension_numbers<[1], [0], [0], [1], [0, 0, 1, 1], [], []>} : vector<64x128xbf16>, vector<128x128xbf16>, vector<64x128xf32> -> vector<64x128xf32>
    %155 = vector.shape_cast %154 : vector<64x128xf32> to vector<8x8x128xf32>
    %c1_57 = arith.constant 1 : index
    %c0_58 = arith.constant 0 : index
    %c0_59 = arith.constant 0 : index
    %156 = vector.load %arg7[%c1_57, %c0_58, %c0_59] : memref<3x1x128xf32, #tpu.memory_space<vmem>>, vector<1x1x128xf32>
    %157 = vector.shape_cast %156 : vector<1x1x128xf32> to vector<1x128xf32>
    %158 = vector.shape_cast %157 : vector<1x128xf32> to vector<1x1x128xf32>
    %159 = vector.broadcast %158 : vector<1x1x128xf32> to vector<8x8x128xf32>
    %160 = arith.mulf %118, %159 : vector<8x8x128xf32>
    %161 = arith.addf %155, %160 : vector<8x8x128xf32>
    %162 = arith.mulf %161, %161 : vector<8x8x128xf32>
    %163 = arith.mulf %161, %162 : vector<8x8x128xf32>
    %cst_60 = arith.constant 4.471500e-02 : f32
    %164 = vector.broadcast %cst_60 : f32 to vector<8x8x128xf32>
    %165 = arith.mulf %164, %163 : vector<8x8x128xf32>
    %166 = arith.addf %161, %165 : vector<8x8x128xf32>
    %cst_61 = arith.constant 0.797884583 : f32
    %167 = vector.broadcast %cst_61 : f32 to vector<8x8x128xf32>
    %168 = arith.mulf %167, %166 : vector<8x8x128xf32>
    %169 = math.tanh %168 : vector<8x8x128xf32>
    %cst_62 = arith.constant 1.000000e+00 : f32
    %170 = vector.broadcast %cst_62 : f32 to vector<8x8x128xf32>
    %171 = arith.addf %170, %169 : vector<8x8x128xf32>
    %cst_63 = arith.constant 5.000000e-01 : f32
    %172 = vector.broadcast %cst_63 : f32 to vector<8x8x128xf32>
    %173 = arith.mulf %172, %171 : vector<8x8x128xf32>
    %174 = arith.mulf %161, %173 : vector<8x8x128xf32>
    %175 = arith.addf %90, %174 : vector<8x8x128xf32>
    %cst_64 = arith.constant dense<0.000000e+00> : vector<8x8xf32>
    %176 = vector.multi_reduction <add>, %175, %cst_64 [2] : vector<8x8x128xf32> to vector<8x8xf32>
    %177 = vector.shape_cast %176 : vector<8x8xf32> to vector<8x8x1xf32>
    %cst_65 = arith.constant 5.000000e-02 : f32
    %178 = vector.broadcast %cst_65 : f32 to vector<8x8x1xf32>
    %179 = arith.mulf %177, %178 : vector<8x8x1xf32>
    %180 = vector.broadcast %179 : vector<8x8x1xf32> to vector<8x8x128xf32>
    %181 = arith.subf %175, %180 : vector<8x8x128xf32>
    %182 = vector.broadcast %5 : vector<1x1x128xf32> to vector<8x8x128xf32>
    %183 = arith.mulf %181, %182 : vector<8x8x128xf32>
    %184 = arith.mulf %183, %183 : vector<8x8x128xf32>
    %cst_66 = arith.constant dense<0.000000e+00> : vector<8x8xf32>
    %185 = vector.multi_reduction <add>, %184, %cst_66 [2] : vector<8x8x128xf32> to vector<8x8xf32>
    %186 = vector.shape_cast %185 : vector<8x8xf32> to vector<8x8x1xf32>
    %cst_67 = arith.constant 5.000000e-02 : f32
    %187 = vector.broadcast %cst_67 : f32 to vector<8x8x1xf32>
    %188 = arith.mulf %186, %187 : vector<8x8x1xf32>
    %cst_68 = arith.constant 9.99999974E-6 : f32
    %189 = vector.broadcast %cst_68 : f32 to vector<8x8x1xf32>
    %190 = arith.addf %188, %189 : vector<8x8x1xf32>
    %191 = math.rsqrt %190 : vector<8x8x1xf32>
    %192 = vector.broadcast %191 : vector<8x8x1xf32> to vector<8x8x128xf32>
    %193 = arith.mulf %183, %192 : vector<8x8x128xf32>
    %c2 = arith.constant 2 : index
    %c0_69 = arith.constant 0 : index
    %c0_70 = arith.constant 0 : index
    %194 = vector.load %arg2[%c2, %c0_69, %c0_70] : memref<3x1x128xf32, #tpu.memory_space<vmem>>, vector<1x1x128xf32>
    %195 = vector.shape_cast %194 : vector<1x1x128xf32> to vector<1x128xf32>
    %196 = vector.shape_cast %195 : vector<1x128xf32> to vector<1x1x128xf32>
    %197 = vector.broadcast %196 : vector<1x1x128xf32> to vector<8x8x128xf32>
    %198 = arith.mulf %193, %197 : vector<8x8x128xf32>
    %c2_71 = arith.constant 2 : index
    %c0_72 = arith.constant 0 : index
    %c0_73 = arith.constant 0 : index
    %199 = vector.load %arg3[%c2_71, %c0_72, %c0_73] : memref<3x1x128xf32, #tpu.memory_space<vmem>>, vector<1x1x128xf32>
    %200 = vector.shape_cast %199 : vector<1x1x128xf32> to vector<1x128xf32>
    %201 = vector.shape_cast %200 : vector<1x128xf32> to vector<1x1x128xf32>
    %202 = vector.broadcast %201 : vector<1x1x128xf32> to vector<8x8x128xf32>
    %203 = arith.addf %198, %202 : vector<8x8x128xf32>
    %204 = arith.truncf %203 : vector<8x8x128xf32> to vector<8x8x128xbf16>
    %205 = vector.shape_cast %204 : vector<8x8x128xbf16> to vector<64x128xbf16>
    %c2_74 = arith.constant 2 : index
    %c0_75 = arith.constant 0 : index
    %c0_76 = arith.constant 0 : index
    %206 = vector.load %arg5[%c2_74, %c0_75, %c0_76] : memref<3x128x128xbf16, #tpu.memory_space<vmem>>, vector<1x128x128xbf16>
    %207 = vector.shape_cast %206 : vector<1x128x128xbf16> to vector<128x128xbf16>
    %cst_77 = arith.constant dense<0.000000e+00> : vector<64x128xf32>
    %208 = tpu.matmul %205, %207, %cst_77 {dimension_numbers = #tpu.dot_dimension_numbers<[1], [0], [0], [1], [0, 0, 1, 1], [], []>} : vector<64x128xbf16>, vector<128x128xbf16>, vector<64x128xf32> -> vector<64x128xf32>
    %209 = vector.shape_cast %208 : vector<64x128xf32> to vector<8x8x128xf32>
    %c2_78 = arith.constant 2 : index
    %c0_79 = arith.constant 0 : index
    %c0_80 = arith.constant 0 : index
    %210 = vector.load %arg4[%c2_78, %c0_79, %c0_80] : memref<3x1x128xf32, #tpu.memory_space<vmem>>, vector<1x1x128xf32>
    %211 = vector.shape_cast %210 : vector<1x1x128xf32> to vector<1x128xf32>
    %cst_81 = arith.constant 0.000000e+00 : f32
    %212 = vector.broadcast %cst_81 : f32 to vector<1x8x128xf32>
    %213 = vector.extract_strided_slice %209 {offsets = [0, 0, 0], sizes = [7, 8, 128], strides = [1, 1, 1]} : vector<8x8x128xf32> to vector<7x8x128xf32>
    %214 = tpu.concatenate %212, %213 in 0 : vector<1x8x128xf32>, vector<7x8x128xf32> -> vector<8x8x128xf32>
    %215 = vector.shape_cast %211 : vector<1x128xf32> to vector<1x1x128xf32>
    %216 = vector.broadcast %215 : vector<1x1x128xf32> to vector<8x8x128xf32>
    %217 = arith.mulf %216, %214 : vector<8x8x128xf32>
    %218 = arith.addf %209, %217 : vector<8x8x128xf32>
    %219 = arith.mulf %211, %211 : vector<1x128xf32>
    %cst_82 = arith.constant 0.000000e+00 : f32
    %220 = vector.broadcast %cst_82 : f32 to vector<2x8x128xf32>
    %221 = vector.extract_strided_slice %218 {offsets = [0, 0, 0], sizes = [6, 8, 128], strides = [1, 1, 1]} : vector<8x8x128xf32> to vector<6x8x128xf32>
    %222 = tpu.concatenate %220, %221 in 0 : vector<2x8x128xf32>, vector<6x8x128xf32> -> vector<8x8x128xf32>
    %223 = vector.shape_cast %219 : vector<1x128xf32> to vector<1x1x128xf32>
    %224 = vector.broadcast %223 : vector<1x1x128xf32> to vector<8x8x128xf32>
    %225 = arith.mulf %224, %222 : vector<8x8x128xf32>
    %226 = arith.addf %218, %225 : vector<8x8x128xf32>
    %227 = arith.mulf %219, %219 : vector<1x128xf32>
    %cst_83 = arith.constant 0.000000e+00 : f32
    %228 = vector.broadcast %cst_83 : f32 to vector<4x8x128xf32>
    %229 = vector.extract_strided_slice %226 {offsets = [0, 0, 0], sizes = [4, 8, 128], strides = [1, 1, 1]} : vector<8x8x128xf32> to vector<4x8x128xf32>
    %230 = tpu.concatenate %228, %229 in 0 : vector<4x8x128xf32>, vector<4x8x128xf32> -> vector<8x8x128xf32>
    %231 = vector.shape_cast %227 : vector<1x128xf32> to vector<1x1x128xf32>
    %232 = vector.broadcast %231 : vector<1x1x128xf32> to vector<8x8x128xf32>
    %233 = arith.mulf %232, %230 : vector<8x8x128xf32>
    %234 = arith.addf %226, %233 : vector<8x8x128xf32>
    %235 = vector.extract_strided_slice %234 {offsets = [7, 0, 0], sizes = [1, 8, 128], strides = [1, 1, 1]} : vector<8x8x128xf32> to vector<1x8x128xf32>
    %236 = vector.shape_cast %235 : vector<1x8x128xf32> to vector<8x128xf32>
    %237 = arith.truncf %236 : vector<8x128xf32> to vector<8x128xbf16>
    %c2_84 = arith.constant 2 : index
    %c0_85 = arith.constant 0 : index
    %c0_86 = arith.constant 0 : index
    %238 = vector.load %arg6[%c2_84, %c0_85, %c0_86] : memref<3x128x128xbf16, #tpu.memory_space<vmem>>, vector<1x128x128xbf16>
    %239 = vector.shape_cast %238 : vector<1x128x128xbf16> to vector<128x128xbf16>
    %cst_87 = arith.constant dense<0.000000e+00> : vector<8x128xf32>
    %240 = tpu.matmul %237, %239, %cst_87 {dimension_numbers = #tpu.dot_dimension_numbers<[1], [0], [0], [1], [0, 0, 1, 1], [], []>} : vector<8x128xbf16>, vector<128x128xbf16>, vector<8x128xf32> -> vector<8x128xf32>
    %241 = vector.extract_strided_slice %203 {offsets = [7, 0, 0], sizes = [1, 8, 128], strides = [1, 1, 1]} : vector<8x8x128xf32> to vector<1x8x128xf32>
    %242 = vector.shape_cast %241 : vector<1x8x128xf32> to vector<8x128xf32>
    %c2_88 = arith.constant 2 : index
    %c0_89 = arith.constant 0 : index
    %c0_90 = arith.constant 0 : index
    %243 = vector.load %arg7[%c2_88, %c0_89, %c0_90] : memref<3x1x128xf32, #tpu.memory_space<vmem>>, vector<1x1x128xf32>
    %244 = vector.shape_cast %243 : vector<1x1x128xf32> to vector<1x128xf32>
    %245 = vector.broadcast %244 : vector<1x128xf32> to vector<8x128xf32>
    %246 = arith.mulf %242, %245 : vector<8x128xf32>
    %247 = arith.addf %240, %246 : vector<8x128xf32>
    %248 = vector.extract_strided_slice %175 {offsets = [7, 0, 0], sizes = [1, 8, 128], strides = [1, 1, 1]} : vector<8x8x128xf32> to vector<1x8x128xf32>
    %249 = vector.shape_cast %248 : vector<1x8x128xf32> to vector<8x128xf32>
    %250 = arith.mulf %247, %247 : vector<8x128xf32>
    %251 = arith.mulf %247, %250 : vector<8x128xf32>
    %cst_91 = arith.constant 4.471500e-02 : f32
    %252 = vector.broadcast %cst_91 : f32 to vector<8x128xf32>
    %253 = arith.mulf %252, %251 : vector<8x128xf32>
    %254 = arith.addf %247, %253 : vector<8x128xf32>
    %cst_92 = arith.constant 0.797884583 : f32
    %255 = vector.broadcast %cst_92 : f32 to vector<8x128xf32>
    %256 = arith.mulf %255, %254 : vector<8x128xf32>
    %257 = math.tanh %256 : vector<8x128xf32>
    %cst_93 = arith.constant 1.000000e+00 : f32
    %258 = vector.broadcast %cst_93 : f32 to vector<8x128xf32>
    %259 = arith.addf %258, %257 : vector<8x128xf32>
    %cst_94 = arith.constant 5.000000e-01 : f32
    %260 = vector.broadcast %cst_94 : f32 to vector<8x128xf32>
    %261 = arith.mulf %260, %259 : vector<8x128xf32>
    %262 = arith.mulf %247, %261 : vector<8x128xf32>
    %263 = arith.addf %249, %262 : vector<8x128xf32>
    %264 = arith.truncf %263 : vector<8x128xf32> to vector<8x128xbf16>
    %c0_95 = arith.constant 0 : index
    %c0_96 = arith.constant 0 : index
    %265 = vector.load %arg8[%c0_95, %c0_96] : memref<128x256xbf16, #tpu.memory_space<vmem>>, vector<128x256xbf16>
    %cst_97 = arith.constant dense<0.000000e+00> : vector<8x256xf32>
    %266 = tpu.matmul %264, %265, %cst_97 {dimension_numbers = #tpu.dot_dimension_numbers<[1], [0], [0], [1], [0, 0, 1, 1], [], []>} : vector<8x128xbf16>, vector<128x256xbf16>, vector<8x256xf32> -> vector<8x256xf32>
    %c0_98 = arith.constant 0 : index
    %c0_99 = arith.constant 0 : index
    %267 = vector.load %arg9[%c0_98, %c0_99] : memref<1x256xf32, #tpu.memory_space<vmem>>, vector<1x256xf32>
    %268 = vector.broadcast %267 : vector<1x256xf32> to vector<8x256xf32>
    %269 = arith.addf %266, %268 : vector<8x256xf32>
    %cst_100 = arith.constant 0.000000e+00 : f32
    %270 = vector.broadcast %cst_100 : f32 to vector<8x256xf32>
    %271 = arith.maximumf %269, %270 : vector<8x256xf32>
    %272 = arith.truncf %271 : vector<8x256xf32> to vector<8x256xbf16>
    %c0_101 = arith.constant 0 : index
    %c0_102 = arith.constant 0 : index
    %273 = vector.load %arg10[%c0_101, %c0_102] : memref<256x128xbf16, #tpu.memory_space<vmem>>, vector<256x128xbf16>
    %cst_103 = arith.constant dense<0.000000e+00> : vector<8x128xf32>
    %274 = tpu.matmul %272, %273, %cst_103 {dimension_numbers = #tpu.dot_dimension_numbers<[1], [0], [0], [1], [0, 0, 1, 1], [], []>} : vector<8x256xbf16>, vector<256x128xbf16>, vector<8x128xf32> -> vector<8x128xf32>
    %c0_104 = arith.constant 0 : index
    %c0_105 = arith.constant 0 : index
    %275 = vector.load %arg11[%c0_104, %c0_105] : memref<1x128xf32, #tpu.memory_space<vmem>>, vector<1x128xf32>
    %276 = vector.broadcast %275 : vector<1x128xf32> to vector<8x128xf32>
    %277 = arith.addf %274, %276 : vector<8x128xf32>
    %cst_106 = arith.constant 0.000000e+00 : f32
    %278 = vector.broadcast %cst_106 : f32 to vector<8x128xf32>
    %279 = arith.maximumf %277, %278 : vector<8x128xf32>
    %280 = arith.truncf %279 : vector<8x128xf32> to vector<8x128xbf16>
    %c0_107 = arith.constant 0 : index
    %c0_108 = arith.constant 0 : index
    %281 = vector.load %arg12[%c0_107, %c0_108] : memref<128x128xbf16, #tpu.memory_space<vmem>>, vector<128x128xbf16>
    %cst_109 = arith.constant dense<0.000000e+00> : vector<8x128xf32>
    %282 = tpu.matmul %280, %281, %cst_109 {dimension_numbers = #tpu.dot_dimension_numbers<[1], [0], [0], [1], [0, 0, 1, 1], [], []>} : vector<8x128xbf16>, vector<128x128xbf16>, vector<8x128xf32> -> vector<8x128xf32>
    %c0_110 = arith.constant 0 : index
    %c0_111 = arith.constant 0 : index
    %283 = vector.load %arg13[%c0_110, %c0_111] : memref<1x128xf32, #tpu.memory_space<vmem>>, vector<1x128xf32>
    %284 = vector.broadcast %283 : vector<1x128xf32> to vector<8x128xf32>
    %285 = arith.addf %282, %284 : vector<8x128xf32>
    %c0_112 = arith.constant 0 : index
    %c0_113 = arith.constant 0 : index
    %286 = vector.load %arg14[%c0_112, %c0_113] : memref<8x128xf32, #tpu.memory_space<vmem>>, vector<8x128xf32>
    tpu.vector_store %arg14[%c0_112, %c0_113], %285 {strides = array<i32>} : memref<8x128xf32, #tpu.memory_space<vmem>>, vector<8x128xf32>,
    return
  }
  func.func @transform_0(%arg0: i32) -> (i32, i32, i32) {
    %c0_i32 = arith.constant 0 : i32
    %c0_i32_0 = arith.constant 0 : i32
    %c0_i32_1 = arith.constant 0 : i32
    return %c0_i32, %arg0, %c0_i32_0 : i32, i32, i32
  }
  func.func @transform_1(%arg0: i32) -> (i32, i32, i32) {
    %c0_i32 = arith.constant 0 : i32
    %c0_i32_0 = arith.constant 0 : i32
    %c0_i32_1 = arith.constant 0 : i32
    %c0_i32_2 = arith.constant 0 : i32
    return %c0_i32, %c0_i32_0, %c0_i32_1 : i32, i32, i32
  }
  func.func @transform_2(%arg0: i32) -> (i32, i32, i32) {
    %c0_i32 = arith.constant 0 : i32
    %c0_i32_0 = arith.constant 0 : i32
    %c0_i32_1 = arith.constant 0 : i32
    %c0_i32_2 = arith.constant 0 : i32
    return %c0_i32, %c0_i32_0, %c0_i32_1 : i32, i32, i32
  }
  func.func @transform_3(%arg0: i32) -> (i32, i32, i32) {
    %c0_i32 = arith.constant 0 : i32
    %c0_i32_0 = arith.constant 0 : i32
    %c0_i32_1 = arith.constant 0 : i32
    %c0_i32_2 = arith.constant 0 : i32
    return %c0_i32, %c0_i32_0, %c0_i32_1 : i32, i32, i32
  }
  func.func @transform_4(%arg0: i32) -> (i32, i32, i32) {
    %c0_i32 = arith.constant 0 : i32
    %c0_i32_0 = arith.constant 0 : i32
    %c0_i32_1 = arith.constant 0 : i32
    %c0_i32_2 = arith.constant 0 : i32
    return %c0_i32, %c0_i32_0, %c0_i32_1 : i32, i32, i32
  }
  func.func @transform_5(%arg0: i32) -> (i32, i32, i32) {
    %c0_i32 = arith.constant 0 : i32
    %c0_i32_0 = arith.constant 0 : i32
    %c0_i32_1 = arith.constant 0 : i32
    %c0_i32_2 = arith.constant 0 : i32
    return %c0_i32, %c0_i32_0, %c0_i32_1 : i32, i32, i32
  }
  func.func @transform_6(%arg0: i32) -> (i32, i32, i32) {
    %c0_i32 = arith.constant 0 : i32
    %c0_i32_0 = arith.constant 0 : i32
    %c0_i32_1 = arith.constant 0 : i32
    %c0_i32_2 = arith.constant 0 : i32
    return %c0_i32, %c0_i32_0, %c0_i32_1 : i32, i32, i32
  }
  func.func @transform_7(%arg0: i32) -> (i32, i32) {
    %c0_i32 = arith.constant 0 : i32
    %c0_i32_0 = arith.constant 0 : i32
    %c0_i32_1 = arith.constant 0 : i32
    return %c0_i32, %c0_i32_0 : i32, i32
  }
  func.func @transform_8(%arg0: i32) -> (i32, i32) {
    %c0_i32 = arith.constant 0 : i32
    %c0_i32_0 = arith.constant 0 : i32
    %c0_i32_1 = arith.constant 0 : i32
    return %c0_i32, %c0_i32_0 : i32, i32
  }
  func.func @transform_9(%arg0: i32) -> (i32, i32) {
    %c0_i32 = arith.constant 0 : i32
    %c0_i32_0 = arith.constant 0 : i32
    %c0_i32_1 = arith.constant 0 : i32
    return %c0_i32, %c0_i32_0 : i32, i32
  }
  func.func @transform_10(%arg0: i32) -> (i32, i32) {
    %c0_i32 = arith.constant 0 : i32
    %c0_i32_0 = arith.constant 0 : i32
    %c0_i32_1 = arith.constant 0 : i32
    return %c0_i32, %c0_i32_0 : i32, i32
  }
  func.func @transform_11(%arg0: i32) -> (i32, i32) {
    %c0_i32 = arith.constant 0 : i32
    %c0_i32_0 = arith.constant 0 : i32
    %c0_i32_1 = arith.constant 0 : i32
    return %c0_i32, %c0_i32_0 : i32, i32
  }
  func.func @transform_12(%arg0: i32) -> (i32, i32) {
    %c0_i32 = arith.constant 0 : i32
    %c0_i32_0 = arith.constant 0 : i32
    %c0_i32_1 = arith.constant 0 : i32
    return %c0_i32, %c0_i32_0 : i32, i32
  }
  func.func @transform_13(%arg0: i32) -> (i32, i32) {
    %c0_i32 = arith.constant 0 : i32
    %c0_i32_0 = arith.constant 0 : i32
    return %arg0, %c0_i32 : i32, i32
  }
}

</mosaic_0001>

<bundles_post_ra>
// kernel: forward.1
= control target key start
LH: loop header
LB: loop body
LE: loop exit
PB: predicated region body
PF: predicated region fallthrough
CT: control target
= control target key end

     0   :  { %18 = vsyncpa [#allocation3], 0  ;;  %s3957_s0 = inlined_call_operand.vmem [shape: f32[8,8,128], index: 0, kind: input, shape index: {}]   ;;  %s3958_s1 = inlined_call_operand.hbm [shape: f32[3,1,128], index: 1, kind: input, shape index: {}]   ;;  %s3959_s2 = inlined_call_operand.hbm [shape: f32[3,1,128], index: 2, kind: input, shape index: {}]   ;;  %s3960_s3 = inlined_call_operand.hbm [shape: f32[3,1,128], index: 3, kind: input, shape index: {}]   ;;  %s3961_s4 = inlined_call_operand.vmem [shape: bf16[3,128,128], index: 4, kind: input, shape index: {}]   ;;  %s3962_s5 = inlined_call_operand.hbm [shape: bf16[3,128,128], index: 5, kind: input, shape index: {}]   ;;  %s3963_s6 = inlined_call_operand.hbm [shape: f32[3,1,128], index: 6, kind: input, shape index: {}]   ;;  %s3964_s7 = inlined_call_operand.vmem [shape: bf16[128,256], index: 7, kind: input, shape index: {}]   ;;  %s3965_s8 = inlined_call_operand.hbm [shape: f32[1,256], index: 8, kind: input, shape index: {}]   ;;  %s3966_s9 = inlined_call_operand.hbm [shape: bf16[256,128], index: 9, kind: input, shape index: {}]   ;;  %s3967_s10 = inlined_call_operand.vmem [shape: f32[1,128], index: 10, kind: input, shape index: {}]   ;;  %s3968_s11 = inlined_call_operand.vmem [shape: bf16[128,128], index: 11, kind: input, shape index: {}]   ;;  %s3969_s12 = inlined_call_operand.hbm [shape: f32[1,128], index: 12, kind: input, shape index: {}]   ;;  %s3970_s13 = inlined_call_operand.vmem [shape: f32[8,128], index: 13, kind: output, shape index: {}]  }
   0x1   :  { %19 = vsyncpa [#allocation5], 0 }
   0x2   :  { %20 = vsyncpa [#allocation8], 0 }
   0x3   :  { %21 = vsyncpa [#allocation11], 0 }
   0x4   :  { %22 = vsyncpa [#allocation14], 0  ;;  %s3119_s25 = smov [#allocation4]   ;;  %s3120_s27 = smov [#allocation7]  }
   0x5   :  { %s42_s26 = sshll.u32 %s3119_s25, 4  ;;  %s68_s28 = sshll.u32 %s3120_s27, 4  ;;  %s43_s26 = int_to_ptr.vmem [resolvable:$true] %s42_s26  ;;  %s3204_s28 = int_to_ptr.vmem [resolvable:$true] %s68_s28 }
   0x6   :  { %s2933_s14 = scalar_lea.hbm %s3959_s2, 48 }
   0x7   :  { %p2934_p0 = scmp.ne.s32.totalorder %s3959_s2, %s2933_s14  ;;  %p2937_p1 = scmp.lt.u32.totalorder %s2933_s14, %s3959_s2 }
   0x9   :  { %p2939_p2 = pnand %p2937_p1, %p2934_p0 }
   0xb   :  { %2942 = shalt.err (!%p2939_p2)
}
   0xc   :  { %s2943_s19 = scalar_lea.vmem %s43_s26, 48  ;;  %s2947_s20 = scalar_lea.vmem %s43_s26, 64 }
   0xd   :  { %p2944_p3 = scmp.ne.s32.totalorder %s43_s26, %s2943_s19  ;;  %p2948_p4 = scmp.lt.s32.totalorder %s43_s26, %s43_s26 }
   0xe   :  { %p2949_p5 = scmp.lt.s32.totalorder %s2947_s20, %s2943_s19 }
  0x10   :  { %p2950_p6 = por %p2949_p5, %p2948_p4 }
  0x12   :  { %p2951_p7 = pnand %p2950_p6, %p2944_p3 }
  0x14   :  { %2954 = shalt.err (!%p2951_p7)
}
  0x15   :  { %s3121_s21 = smov 16   ;;  %s3122_s22 = smov 1  }
  0x16   :  { %48 = dma.hbm_to_vmem [thread:$0]  %s3959_s2, 48, %s43_s26, [#allocation5], %s3121_s21, %s3121_s21, %s3122_s22  }
  0x17   :  { %s2955_s29 = scalar_lea.hbm %s3962_s5, 3072 }
  0x18   :  { %p2956_p8 = scmp.ne.s32.totalorder %s3962_s5, %s2955_s29  ;;  %p2959_p9 = scmp.lt.u32.totalorder %s2955_s29, %s3962_s5 }
  0x1a   :  { %p2961_p10 = pnand %p2959_p9, %p2956_p8 }
  0x1c   :  { %2964 = shalt.err (!%p2961_p10)
}
  0x1d   :  { %s2965_s17 = scalar_lea.vmem %s3204_s28, 3072  ;;  %p2970_p12 = scmp.lt.s32.totalorder %s3204_s28, %s3204_s28 }
  0x1e   :  { %p2966_p11 = scmp.ne.s32.totalorder %s3204_s28, %s2965_s17  ;;  %p2971_p13 = scmp.lt.s32.totalorder %s2965_s17, %s2965_s17 }
  0x20   :  { %p2972_p0 = por %p2971_p13, %p2970_p12 }
  0x22   :  { %p2973_p1 = pnand %p2972_p0, %p2966_p11 }
  0x24   :  { %2976 = shalt.err (!%p2973_p1)
}
  0x25   :  { %s3123_s2 = smov 64   ;;  %s3124_s26 = smov 4  }
  0x26   :  { %74 = dma.hbm_to_vmem [thread:$0]  %s3962_s5, 3072, %s3204_s28, [#allocation8], %s3123_s2, %s3123_s2, %s3124_s26  }
  0x27   :  { %s3125_s20 = smov [#allocation10]   ;;  %s3126_s24 = smov [#allocation2]  }
  0x28   :  { %s95_s23 = sshll.u32 %s3125_s20, 4  ;;  %s30_s25 = sshll.u32 %s3126_s24, 4  ;;  %s96_s23 = int_to_ptr.vmem [resolvable:$true] %s95_s23  ;;  %s3241_s25 = int_to_ptr.vmem [resolvable:$true] %s30_s25 }
  0x29   :  { %s2977_s30 = scalar_lea.hbm %s3965_s8, 32 }
  0x2a   :  { %p2978_p2 = scmp.ne.s32.totalorder %s3965_s8, %s2977_s30  ;;  %p2981_p3 = scmp.lt.u32.totalorder %s2977_s30, %s3965_s8 }
  0x2c   :  { %p2983_p4 = pnand %p2981_p3, %p2978_p2 }
  0x2e   :  { %2986 = shalt.err (!%p2983_p4)
}
  0x2f   :  { %s2987_s5 = scalar_lea.vmem %s96_s23, 32  ;;  %p2992_p6 = scmp.lt.s32.totalorder %s96_s23, %s96_s23 }
  0x30   :  { %p2988_p5 = scmp.ne.s32.totalorder %s96_s23, %s2987_s5  ;;  %p2993_p7 = scmp.lt.s32.totalorder %s2987_s5, %s2987_s5 }
  0x32   :  { %p2994_p8 = por %p2993_p7, %p2992_p6 }
  0x34   :  { %p2995_p9 = pnand %p2994_p8, %p2988_p5 }
  0x36   :  { %2998 = shalt.err (!%p2995_p9)
}
  0x37   :  { %98 = dma.hbm_to_vmem [thread:$0]  %s3965_s8, 32, %s96_s23, [#allocation11]  }
  0x38   :  { %s2999_s24 = scalar_lea.hbm %s3958_s1, 48 }
  0x39   :  { %p3000_p10 = scmp.ne.s32.totalorder %s3958_s1, %s2999_s24  ;;  %p3003_p11 = scmp.lt.u32.totalorder %s2999_s24, %s3958_s1 }
  0x3b   :  { %p3005_p12 = pnand %p3003_p11, %p3000_p10 }
  0x3d   :  { %3008 = shalt.err (!%p3005_p12)
}
  0x3e   :  { %s3009_s15 = scalar_lea.vmem %s3241_s25, 48  ;;  %s3013_s8 = scalar_lea.vmem %s3241_s25, 64 }
  0x3f   :  { %p3010_p13 = scmp.ne.s32.totalorder %s3241_s25, %s3009_s15  ;;  %p3014_p0 = scmp.lt.s32.totalorder %s3241_s25, %s3241_s25 }
  0x40   :  { %p3015_p1 = scmp.lt.s32.totalorder %s3013_s8, %s3009_s15 }
  0x42   :  { %p3016_p2 = por %p3015_p1, %p3014_p0 }
  0x44   :  { %p3017_p3 = pnand %p3016_p2, %p3010_p13 }
  0x46   :  { %3020 = shalt.err (!%p3017_p3)
}
  0x47   :  { %36 = dma.hbm_to_vmem [thread:$0]  %s3958_s1, 48, %s3241_s25, [#allocation3], %s3121_s21, %s3121_s21, %s3122_s22  }
  0x48   :  { %s3127_s17 = smov [#allocation6]   ;;  %s3128_s28 = smov [#allocation9]  }
  0x49   :  { %s54_s5 = sshll.u32 %s3127_s17, 4  ;;  %s80_s18 = sshll.u32 %s3128_s28, 4  ;;  %s55_s5 = int_to_ptr.vmem [resolvable:$true] %s54_s5  ;;  %s3276_s18 = int_to_ptr.vmem [resolvable:$true] %s80_s18 }
  0x4a   :  { %s3021_s24 = scalar_lea.hbm %s3960_s3, 48 }
  0x4b   :  { %p3022_p4 = scmp.ne.s32.totalorder %s3960_s3, %s3021_s24  ;;  %p3025_p5 = scmp.lt.u32.totalorder %s3021_s24, %s3960_s3 }
  0x4d   :  { %p3027_p6 = pnand %p3025_p5, %p3022_p4 }
  0x4f   :  { %3030 = shalt.err (!%p3027_p6)
}
  0x50   :  { %s3031_s1 = scalar_lea.vmem %s55_s5, 48  ;;  %s3035_s25 = scalar_lea.vmem %s55_s5, 64 }
  0x51   :  { %p3032_p7 = scmp.ne.s32.totalorder %s55_s5, %s3031_s1  ;;  %p3036_p8 = scmp.lt.s32.totalorder %s55_s5, %s55_s5 }
  0x52   :  { %p3037_p9 = scmp.lt.s32.totalorder %s3035_s25, %s3031_s1 }
  0x54   :  { %p3038_p10 = por %p3037_p9, %p3036_p8 }
  0x56   :  { %p3039_p11 = pnand %p3038_p10, %p3032_p7 }
  0x58   :  { %3042 = shalt.err (!%p3039_p11)
}
  0x59   :  { %60 = dma.hbm_to_vmem [thread:$0]  %s3960_s3, 48, %s55_s5, [#allocation5], %s3121_s21, %s3121_s21, %s3122_s22  }
  0x5a   :  { %s3043_s17 = scalar_lea.hbm %s3963_s6, 48 }
  0x5b   :  { %p3044_p12 = scmp.ne.s32.totalorder %s3963_s6, %s3043_s17  ;;  %p3047_p13 = scmp.lt.u32.totalorder %s3043_s17, %s3963_s6 }
  0x5d   :  { %p3049_p0 = pnand %p3047_p13, %p3044_p12 }
  0x5f   :  { %3052 = shalt.err (!%p3049_p0)
}
  0x60   :  { %s3053_s27 = scalar_lea.vmem %s3276_s18, 48  ;;  %s3057_s3 = scalar_lea.vmem %s3276_s18, 64 }
  0x61   :  { %p3054_p1 = scmp.ne.s32.totalorder %s3276_s18, %s3053_s27  ;;  %p3058_p2 = scmp.lt.s32.totalorder %s3276_s18, %s3276_s18 }
  0x62   :  { %p3059_p3 = scmp.lt.s32.totalorder %s3057_s3, %s3053_s27 }
  0x64   :  { %p3060_p4 = por %p3059_p3, %p3058_p2 }
  0x66   :  { %p3061_p5 = pnand %p3060_p4, %p3054_p1 }
  0x68   :  { %3064 = shalt.err (!%p3061_p5)
}
  0x69   :  { %86 = dma.hbm_to_vmem [thread:$0]  %s3963_s6, 48, %s3276_s18, [#allocation8], %s3121_s21, %s3121_s21, %s3122_s22  }
  0x6a   :  { %s3129_s30 = smov [#allocation12]   ;;  %s3130_s1 = smov [#allocation13]  }
  0x6b   :  { %s104_s14 = sshll.u32 %s3129_s30, 4  ;;  %s121_s25 = sshll.u32 %s3130_s1, 4  ;;  %s105_s14 = int_to_ptr.vmem [resolvable:$true] %s104_s14  ;;  %s122_s25 = int_to_ptr.vmem [resolvable:$true] %s121_s25 }
  0x6c   :  { %s3065_s23 = scalar_lea.hbm %s3966_s9, 2048 }
  0x6d   :  { %p3066_p6 = scmp.ne.s32.totalorder %s3966_s9, %s3065_s23  ;;  %p3069_p7 = scmp.lt.u32.totalorder %s3065_s23, %s3966_s9 }
  0x6f   :  { %p3071_p8 = pnand %p3069_p7, %p3066_p6 }
  0x71   :  { %3074 = shalt.err (!%p3071_p8)
}
  0x72   :  { %s3075_s6 = scalar_lea.vmem %s105_s14, 2048  ;;  %p3080_p10 = scmp.lt.s32.totalorder %s105_s14, %s105_s14 }
  0x73   :  { %p3076_p9 = scmp.ne.s32.totalorder %s105_s14, %s3075_s6  ;;  %p3081_p11 = scmp.lt.s32.totalorder %s3075_s6, %s3075_s6 }
  0x75   :  { %p3082_p12 = por %p3081_p11, %p3080_p10 }
  0x77   :  { %p3083_p13 = pnand %p3082_p12, %p3076_p9 }
  0x79   :  { %3086 = shalt.err (!%p3083_p13)
}
  0x7a   :  { %110 = dma.hbm_to_vmem [thread:$0]  %s3966_s9, 2048, %s105_s14, [#allocation11], %s3123_s2, %s3123_s2, %s3124_s26  }
  0x7b   :  { %s3087_s24 = scalar_lea.hbm %s3969_s12, 16 }
  0x7c   :  { %p3088_p0 = scmp.ne.s32.totalorder %s3969_s12, %s3087_s24  ;;  %p3091_p1 = scmp.lt.u32.totalorder %s3087_s24, %s3969_s12 }
  0x7e   :  { %p3093_p2 = pnand %p3091_p1, %p3088_p0 }
  0x80   :  { %3096 = shalt.err (!%p3093_p2)
}
  0x81   :  { %s3097_s30 = scalar_lea.vmem %s122_s25, 16  ;;  %s3101_s1 = scalar_lea.vmem %s122_s25, 32 }
  0x82   :  { %p3098_p3 = scmp.ne.s32.totalorder %s122_s25, %s3097_s30  ;;  %p3102_p4 = scmp.lt.s32.totalorder %s122_s25, %s122_s25 }
  0x83   :  { %p3103_p5 = scmp.lt.s32.totalorder %s3101_s1, %s3097_s30 }
  0x85   :  { %p3104_p6 = por %p3103_p5, %p3102_p4 }
  0x87   :  { %p3105_p7 = pnand %p3104_p6, %p3098_p3 }
  0x89   :  { %3108 = shalt.err (!%p3105_p7)
}
  0x8a   :  { %124 = dma.hbm_to_vmem [thread:$0]  %s3969_s12, 16, %s122_s25, [#allocation14]  }
  0x8b   :  { %3109 = dma.done.wait [#allocation3], 48  }
  0x8c   :  { %3110 = vsyncadd [#allocation3], 4294967248 }
  0x8d   :  { %3111 = dma.done.wait [#allocation5], 96  }
  0x8e   :  { %3112 = vsyncadd [#allocation5], 4294967200 }
  0x8f   :  { %3113 = dma.done.wait [#allocation8], 3120  }
  0x90   :  { %3114 = vsyncadd [#allocation8], 4294964176 }
  0x91   :  { %3115 = dma.done.wait [#allocation11], 2080  }
  0x92   :  { %3116 = vsyncadd [#allocation11], 4294965216 }
  0x93   :  { %3117 = dma.done.wait [#allocation14], 16  }
  0x94   :  { %3118 = vsyncadd [#allocation14], 4294967280  ;;  %v3344_v0 = vld [vmem:[%s3957_s0] sm:$0xff]  ;;  %v152_v1 = vld [vmem:[%s3957_s0 + $0x10] sm:$0xff]  ;;  %v158_v9 = vlaneseq  ;;  %v3131_v15 = vmov 0.0   ;;  %vm3132_vm1 = vmmov 0  }
  0x95   :  { %163 = vadd.xlane.f32.xlu0 %v3344_v0  ;;  %167 = vadd.xlane.f32.xlu1 %v152_v1  ;;  %v3353_v2 = vld [vmem:[%s3957_s0 + $0x8] sm:$0xff]  ;;  %v153_v3 = vld [vmem:[%s3957_s0 + $0x18] sm:$0xff]  ;;  %v154_v4 = vld [vmem:[%s3957_s0 + $0x20] sm:$0xff] }
  0x96   :  { %v155_v5 = vld [vmem:[%s3957_s0 + $0x28] sm:$0xff]  ;;  %v3368_v6 = vld [vmem:[%s3957_s0 + $0x30] sm:$0xff]  ;;  %v3373_v7 = vld [vmem:[%s3957_s0 + $0x38] sm:$0xff]  ;;  %v159_v10 = vand.u32 127, %v158_v9 }
  0x97   :  { %v2751_v8 = vld [vmem:[%s3961_s4] sm:$0xff]   ;;  %v2752_v53 = vld [vmem:[%s3961_s4 + $0x8] sm:$0xff]   ;;  %v2753_v54 = vld [vmem:[%s3961_s4 + $0x10] sm:$0xff]  }
  0x98   :  { %2576 = vmatprep.subr.bf16.mxu0 %v2751_v8  ;;  %vm160_vm0 = vcmp.lt.s32.totalorder %v159_v10, 20  ;;  %v2754_v55 = vld [vmem:[%s3961_s4 + $0x18] sm:$0xff]   ;;  %v2755_v56 = vld [vmem:[%s3961_s4 + $0x20] sm:$0xff]   ;;  %v2756_v57 = vld [vmem:[%s3961_s4 + $0x28] sm:$0xff]  }
  0x99   :  { %165 = vadd.xlane.f32.xlu0 %v3353_v2  ;;  %169 = vadd.xlane.f32.xlu1 %v153_v3  ;;  %v3382_v16 = vsel %vm160_vm0, 1.0, %v3131_v15  ;;  %v2757_v58 = vld [vmem:[%s3961_s4 + $0x30] sm:$0xff]   ;;  %v2758_v59 = vld [vmem:[%s3961_s4 + $0x38] sm:$0xff]   ;;  %v2762_v63 = vld [vmem:[#allocation7 + $0x18] sm:$0xff]  }
  0x9a   :  { %2577 = vmatpush3.bf16.msra.mxu0 %v2751_v8  ;;  %v2759_v60 = vld [vmem:[#allocation7] sm:$0xff]   ;;  %v2760_v61 = vld [vmem:[#allocation7 + $0x8] sm:$0xff]   ;;  %v2761_v62 = vld [vmem:[#allocation7 + $0x10] sm:$0xff]  }
  0x9b   :  { %2578 = vmatprep.subr.bf16.mxu0 %v2752_v53  ;;  %2600 = vmatprep.subr.bf16.mxu1 %v2759_v60 }
  0x9c   :  { %2601 = vmatpush3.bf16.msra.mxu1 %v2759_v60 }
  0x9d   :  { %171 = vadd.xlane.f32.xlu0 %v154_v4  ;;  %173 = vadd.xlane.f32.xlu1 %v155_v5 }
  0x9e   :  { %2579 = vmatpush3.bf16.msra.mxu0 %v2752_v53  ;;  %2602 = vmatprep.subr.bf16.mxu1 %v2760_v61 }
  0x9f   :  { %2580 = vmatprep.subr.bf16.mxu0 %v2753_v54 }
  0xa0   :  { %2603 = vmatpush3.bf16.msra.mxu1 %v2760_v61 }
  0xa1   :  { %175 = vadd.xlane.f32.xlu0 %v3368_v6  ;;  %177 = vadd.xlane.f32.xlu1 %v3373_v7 }
  0xa2   :  { %2581 = vmatpush3.bf16.msra.mxu0 %v2753_v54  ;;  %2604 = vmatprep.subr.bf16.mxu1 %v2761_v62 }
  0xa3   :  { %2582 = vmatprep.subr.bf16.mxu0 %v2754_v55 }
  0xa4   :  { %2605 = vmatpush3.bf16.msra.mxu1 %v2761_v62 }
  0xa5   :  { %2606 = vmatprep.subr.bf16.mxu1 %v2762_v63 }
  0xa6   :  { %2583 = vmatpush3.bf16.msra.mxu0 %v2754_v55 }
  0xa7   :  { %2584 = vmatprep.subr.bf16.mxu0 %v2755_v56 }
  0xa8   :  { %2607 = vmatpush3.bf16.msra.mxu1 %v2762_v63 }
  0xaa   :  { %2585 = vmatpush3.bf16.msra.mxu0 %v2755_v56 }
  0xab   :  { %2586 = vmatprep.subr.bf16.mxu0 %v2756_v57 }
  0xae   :  { %2587 = vmatpush3.bf16.msra.mxu0 %v2756_v57 }
  0xaf   :  { %2588 = vmatprep.subr.bf16.mxu0 %v2757_v58 }
  0xb2   :  { %2589 = vmatpush3.bf16.msra.mxu0 %v2757_v58 }
  0xb3   :  { %2590 = vmatprep.subr.bf16.mxu0 %v2758_v59 }
  0xb6   :  { %2591 = vmatpush3.bf16.msra.mxu0 %v2758_v59 }
 0x122   :  { %v164_v11 = vpop.xlane.xlu0 %163  ;;  %v168_v12 = vpop.xlane.xlu1 %167 }
 0x123   :  { %v179_v13 = vmul.f32 0.05, %v164_v11  ;;  %v181_v14 = vmul.f32 0.05, %v168_v12 }
 0x125   :  { %v187_v17 = vsub.f32 %v3344_v0, %v179_v13  ;;  %v189_v18 = vsub.f32 %v152_v1, %v181_v14  ;;  %v2763_v1 = vld [vmem:[#allocation7 + $0x20] sm:$0xff]  }
 0x126   :  { %v166_v19 = vpop.xlane.xlu0 %165  ;;  %v170_v20 = vpop.xlane.xlu1 %169  ;;  %2608 = vmatprep.subr.bf16.mxu1 %v2763_v1 }
 0x127   :  { %v180_v21 = vmul.f32 0.05, %v166_v19  ;;  %v182_v22 = vmul.f32 0.05, %v170_v20  ;;  %v3386_v23 = vmul.f32 %v3382_v16, %v187_v17  ;;  %v3389_v24 = vmul.f32 %v3382_v16, %v189_v18  ;;  %2609 = vmatpush3.bf16.msra.mxu1 %v2763_v1 }
 0x129   :  { %v188_v25 = vsub.f32 %v3353_v2, %v180_v21  ;;  %v190_v26 = vsub.f32 %v153_v3, %v182_v22  ;;  %v203_v27 = vmul.f32 %v3386_v23, %v3386_v23  ;;  %v205_v30 = vmul.f32 %v3389_v24, %v3389_v24 }
 0x12a   :  { %v172_v28 = vpop.xlane.xlu0 %171  ;;  %v174_v29 = vpop.xlane.xlu1 %173 }
 0x12b   :  { %v183_v31 = vmul.f32 0.05, %v172_v28  ;;  %211 = vadd.xlane.f32.xlu0 %v203_v27  ;;  %v184_v32 = vmul.f32 0.05, %v174_v29  ;;  %v3397_v33 = vmul.f32 %v3382_v16, %v188_v25  ;;  %v3400_v34 = vmul.f32 %v3382_v16, %v190_v26 }
 0x12d   :  { %v191_v35 = vsub.f32 %v154_v4, %v183_v31  ;;  %v192_v36 = vsub.f32 %v155_v5, %v184_v32  ;;  %v204_v37 = vmul.f32 %v3397_v33, %v3397_v33  ;;  %v206_v40 = vmul.f32 %v3400_v34, %v3400_v34 }
 0x12e   :  { %v176_v38 = vpop.xlane.xlu0 %175  ;;  %v178_v39 = vpop.xlane.xlu1 %177 }
 0x12f   :  { %v185_v41 = vmul.f32 0.05, %v176_v38  ;;  %215 = vadd.xlane.f32.xlu0 %v205_v30  ;;  %213 = vadd.xlane.f32.xlu1 %v204_v37  ;;  %v186_v42 = vmul.f32 0.05, %v178_v39  ;;  %v3407_v43 = vmul.f32 %v3382_v16, %v191_v35  ;;  %v3410_v44 = vmul.f32 %v3382_v16, %v192_v36  ;;  %v2305_v37 = vld [vmem:[#allocation2] ss:$0 sm:$0xff] }
 0x131   :  { %v193_v45 = vsub.f32 %v3368_v6, %v185_v41  ;;  %v194_v46 = vsub.f32 %v3373_v7, %v186_v42  ;;  %v207_v47 = vmul.f32 %v3407_v43, %v3407_v43  ;;  %v208_v48 = vmul.f32 %v3410_v44, %v3410_v44 }
 0x133   :  { %217 = vadd.xlane.f32.xlu1 %v206_v40  ;;  %219 = vadd.xlane.f32.xlu0 %v207_v47  ;;  %v3419_v49 = vmul.f32 %v3382_v16, %v193_v45  ;;  %v3422_v50 = vmul.f32 %v3382_v16, %v194_v46  ;;  %v2306_v45 = vld [vmem:[#allocation4] ss:$0 sm:$0xff] }
 0x135   :  { %v209_v51 = vmul.f32 %v3419_v49, %v3419_v49  ;;  %v210_v52 = vmul.f32 %v3422_v50, %v3422_v50 }
 0x137   :  { %221 = vadd.xlane.f32.xlu1 %v208_v48  ;;  %223 = vadd.xlane.f32.xlu0 %v209_v51 }
 0x13b   :  { %225 = vadd.xlane.f32.xlu1 %v210_v52 }
 0x1b8   :  { %v212_v3 = vpop.xlane.xlu0 %211 }
 0x1b9   :  { %v227_v4 = vmul.f32 0.05, %v212_v3 }
 0x1bb   :  { %v235_v5 = vadd.f32 1e-05, %v227_v4 }
 0x1bc   :  { %v214_v8 = vpop.xlane.xlu1 %213  ;;  %v216_v10 = vpop.xlane.xlu0 %215 }
 0x1bd   :  { %2847 = vrsqrt.f32 %v235_v5  ;;  %v228_v11 = vmul.f32 0.05, %v214_v8  ;;  %v229_v12 = vmul.f32 0.05, %v216_v10 }
 0x1bf   :  { %v236_v13 = vadd.f32 1e-05, %v228_v11  ;;  %v237_v14 = vadd.f32 1e-05, %v229_v12  ;;  %v2764_v12 = vld [vmem:[#allocation7 + $0x28] sm:$0xff]  }
 0x1c0   :  { %v218_v17 = vpop.xlane.xlu1 %217  ;;  %v220_v18 = vpop.xlane.xlu0 %219  ;;  %2610 = vmatprep.subr.bf16.mxu1 %v2764_v12 }
 0x1c1   :  { %2849 = vrsqrt.f32 %v236_v13  ;;  %v230_v19 = vmul.f32 0.05, %v218_v17  ;;  %v231_v20 = vmul.f32 0.05, %v220_v18  ;;  %2611 = vmatpush3.bf16.msra.mxu1 %v2764_v12  ;;  %v2765_v13 = vld [vmem:[#allocation7 + $0x30] sm:$0xff]  }
 0x1c2   :  { %2851 = vrsqrt.f32 %v237_v14  ;;  %2612 = vmatprep.subr.bf16.mxu1 %v2765_v13  ;;  %v3482_v14 = vshrl.u32 %v158_v9, 7  ;;  %v450_v17 = vld [vmem:[#allocation6] sm:$0x1] }
 0x1c3   :  { %v238_v21 = vadd.f32 1e-05, %v230_v19  ;;  %v239_v22 = vadd.f32 1e-05, %v231_v20  ;;  %v473_v19 = vmul.f32 %v450_v17, %v450_v17 }
 0x1c4   :  { %v222_v25 = vpop.xlane.xlu1 %221  ;;  %v224_v26 = vpop.xlane.xlu0 %223  ;;  %v3485_v18 = vsub.s32 0, %v3482_v14 }
 0x1c5   :  { %2853 = vrsqrt.f32 %v238_v21  ;;  %v232_v27 = vmul.f32 0.05, %v222_v25  ;;  %v233_v28 = vmul.f32 0.05, %v224_v26  ;;  %2613 = vmatpush3.bf16.msra.mxu1 %v2765_v13 }
 0x1c6   :  { %2855 = vrsqrt.f32 %v239_v22  ;;  %v455_v20 = vrot.slane %v450_v17, %v3485_v18  ;;  %v478_v21 = vrot.slane %v473_v19, %v3485_v18  ;;  %v495_v22 = vmul.f32 %v473_v19, %v473_v19 }
 0x1c7   :  { %v2848_v29 = vpop.eup %2847  ;;  %v240_v30 = vadd.f32 1e-05, %v232_v27  ;;  %v241_v31 = vadd.f32 1e-05, %v233_v28 }
 0x1c8   :  { %v226_v32 = vpop.xlane.xlu1 %225  ;;  %v251_v35 = vmul.f32 %v2848_v29, %v3386_v23  ;;  %v457_v25 = vmul.f32 0.0, %v455_v20  ;;  %v480_v29 = vmul.f32 0.0, %v478_v21 }
 0x1c9   :  { %2857 = vrsqrt.f32 %v240_v30  ;;  %v234_v36 = vmul.f32 0.05, %v226_v32  ;;  %v500_v30 = vrot.slane %v495_v22, %v3485_v18 }
 0x1ca   :  { %2859 = vrsqrt.f32 %v241_v31  ;;  %v266_v42 = vmul.f32 %v2305_v37, %v251_v35 }
 0x1cb   :  { %v2850_v38 = vpop.eup %2849  ;;  %v242_v39 = vadd.f32 1e-05, %v234_v36 }
 0x1cc   :  { %v2852_v40 = vpop.eup %2851  ;;  %v252_v41 = vmul.f32 %v2850_v38, %v3397_v33  ;;  %v3452_v52 = vadd.f32 %v2306_v45, %v266_v42 }
 0x1cd   :  { %2861 = vrsqrt.f32 %v242_v39  ;;  %v253_v46 = vmul.f32 %v2852_v40, %v3389_v24  ;;  %v502_v40 = vmul.f32 0.0, %v500_v30 }
 0x1ce   :  { %v267_v47 = vmul.f32 %v2305_v37, %v252_v41 }
 0x1cf   :  { %v2854_v48 = vpop.eup %2853  ;;  %v268_v54 = vmul.f32 %v2305_v37, %v253_v46 }
 0x1d0   :  { %v2856_v51 = vpop.eup %2855  ;;  %v3454_v23 = vadd.f32 %v2306_v45, %v267_v47  ;;  %v254_v53 = vmul.f32 %v2854_v48, %v3400_v34 }
 0x1d1   :  { %v255_v55 = vmul.f32 %v2856_v51, %v3407_v43  ;;  %v3460_v24 = vadd.f32 %v2306_v45, %v268_v54 }
 0x1d2   :  { %v2456_v33 = vpack.c.bf16 %v3454_v23, %v3452_v52  ;;  %v269_v56 = vmul.f32 %v2305_v37, %v254_v53 }
 0x1d3   :  { %v2858_v57 = vpop.eup %2857  ;;  %v270_v61 = vmul.f32 %v2305_v37, %v255_v55 }
 0x1d4   :  { %v2860_v58 = vpop.eup %2859  ;;  %2592 = vmatprep.mubr.bf16.mxu0 %v2456_v33  ;;  %v3462_v59 = vadd.f32 %v2306_v45, %v269_v56  ;;  %v256_v60 = vmul.f32 %v2858_v57, %v3410_v44 }
 0x1d5   :  { %v257_v62 = vmul.f32 %v2860_v58, %v3419_v49  ;;  %v3468_v1 = vadd.f32 %v2306_v45, %v270_v61 }
 0x1d6   :  { %v2457_v34 = vpack.c.bf16 %v3462_v59, %v3460_v24  ;;  %v271_v43 = vmul.f32 %v2305_v37, %v256_v60 }
 0x1d7   :  { %v2862_v63 = vpop.eup %2861  ;;  %v272_v5 = vmul.f32 %v2305_v37, %v257_v62 }
 0x1d8   :  { %2593 = vmatmul.mubr.bf16.vlgmr.msra.gmra.mrb[0].mxu0 %v2457_v34  ;;  %v3470_v3 = vadd.f32 %v2306_v45, %v271_v43  ;;  %v258_v4 = vmul.f32 %v2862_v63, %v3422_v50  ;;  %v2766_v50 = vld [vmem:[#allocation7 + $0x38] sm:$0xff]  }
 0x1d9   :  { %v3475_v10 = vadd.f32 %v2306_v45, %v272_v5  ;;  %2614 = vmatprep.subr.bf16.mxu1 %v2766_v50 }
 0x1da   :  { %v2458_v8 = vpack.c.bf16 %v3470_v3, %v3468_v1  ;;  %v273_v44 = vmul.f32 %v2305_v37, %v258_v4  ;;  %2615 = vmatpush3.bf16.msra.mxu1 %v2766_v50 }
 0x1dc   :  { %2596 = vmatprep.mubr.bf16.mxu0 %v2458_v8  ;;  %v3477_v49 = vadd.f32 %v2306_v45, %v273_v44 }
 0x1de   :  { %v2459_v11 = vpack.c.bf16 %v3477_v49, %v3475_v10 }
 0x1e0   :  { %2597 = vmatmul.mubr.bf16.gmra.mrb[4].mxu0 %v2459_v11 }
 0x2ab   :  { %v2594_v26 = vpop.f32.mrb[0].mxu0 }
 0x2ac   :  { %v460_v27 = vmul.f32 %v2594_v26, %v455_v20  ;;  %v419_v28 = vpop.f32.mrb[1].mxu0 }
 0x2ad   :  { %v458_v31 = vmul.f32 %v455_v20, %v419_v28  ;;  %v465_v9 = vadd.f32 %v457_v25, %v419_v28  ;;  %v2595_v32 = vpop.f32.mrb[2].mxu0 }
 0x2ae   :  { %v468_v35 = vadd.f32 %v2595_v32, %v460_v27  ;;  %v422_v36 = vpop.f32.mrb[3].mxu0  ;;  %v461_v47 = vmul.f32 %v2595_v32, %v455_v20 }
 0x2af   :  { %v459_v37 = vmul.f32 %v455_v20, %v422_v36  ;;  %v466_v38 = vadd.f32 %v458_v31, %v422_v36  ;;  %v487_v39 = vadd.f32 %v480_v29, %v465_v9  ;;  %v481_v41 = vmul.f32 %v478_v21, %v465_v9 }
 0x2b0   :  { %v484_v57 = vmul.f32 %v478_v21, %v468_v35 }
 0x2b1   :  { %v467_v42 = vadd.f32 %v2594_v26, %v459_v37  ;;  %v482_v45 = vmul.f32 %v478_v21, %v466_v38  ;;  %v488_v46 = vadd.f32 %v480_v29, %v466_v38  ;;  %v507_v33 = vadd.f32 %v502_v40, %v487_v39  ;;  %v2331_v37 = vld [vmem:[#allocation9] ss:$0 sm:$0xff] }
 0x2b2   :  { %v503_v8 = vmul.f32 %v500_v30, %v487_v39  ;;  %v685_v38 = vmul.f32 %v2331_v37, %v3460_v24 }
 0x2b3   :  { %v489_v48 = vadd.f32 %v481_v41, %v467_v42  ;;  %v490_v51 = vadd.f32 %v482_v45, %v468_v35  ;;  %v2598_v53 = vpop.f32.mrb[4].mxu0  ;;  %v508_v56 = vadd.f32 %v502_v40, %v488_v46  ;;  %v483_v61 = vmul.f32 %v478_v21, %v467_v42 }
 0x2b4   :  { %v464_v54 = vmul.f32 %v2598_v53, %v455_v20  ;;  %v435_v55 = vpop.f32.mrb[5].mxu0  ;;  %v504_v13 = vmul.f32 %v500_v30, %v488_v46  ;;  %v684_v46 = vmul.f32 %v2331_v37, %v3454_v23 }
 0x2b5   :  { %v462_v58 = vmul.f32 %v455_v20, %v435_v55  ;;  %v469_v60 = vadd.f32 %v461_v47, %v435_v55  ;;  %v2599_v62 = vpop.f32.mrb[6].mxu0  ;;  %v2460_v63 = vpack.c.bf16 %v508_v56, %v507_v33  ;;  %v509_v4 = vadd.f32 %v502_v40, %v489_v48 }
 0x2b6   :  { %v472_v34 = vadd.f32 %v2599_v62, %v464_v54  ;;  %v438_v43 = vpop.f32.mrb[7].mxu0  ;;  %v510_v5 = vadd.f32 %v502_v40, %v490_v51  ;;  %v505_v27 = vmul.f32 %v500_v30, %v489_v48  ;;  %v506_v28 = vmul.f32 %v500_v30, %v490_v51 }
 0x2b7   :  { %v491_v44 = vadd.f32 %v483_v61, %v469_v60  ;;  %v463_v11 = vmul.f32 %v455_v20, %v438_v43  ;;  %v470_v12 = vadd.f32 %v462_v58, %v438_v43  ;;  %v485_v50 = vmul.f32 %v478_v21, %v469_v60  ;;  %2616 = vmatprep.mubr.bf16.mxu1 %v2460_v63 }
 0x2b8   :  { %v2461_v17 = vpack.c.bf16 %v510_v5, %v509_v4  ;;  %v683_v40 = vmul.f32 %v2331_v37, %v3452_v52  ;;  %v686_v30 = vmul.f32 %v2331_v37, %v3462_v59  ;;  %v689_v56 = vmul.f32 %v2331_v37, %v3475_v10 }
 0x2b9   :  { %v511_v19 = vadd.f32 %v503_v8, %v491_v44  ;;  %v471_v22 = vadd.f32 %v2598_v53, %v463_v11  ;;  %v486_v25 = vmul.f32 %v478_v21, %v470_v12  ;;  %v492_v26 = vadd.f32 %v484_v57, %v470_v12 }
 0x2ba   :  { %2617 = vmatmul.mubr.bf16.vlgmr.msra.gmra.mrb[0].mxu1 %v2461_v17  ;;  %v687_v61 = vmul.f32 %v2331_v37, %v3468_v1  ;;  %v690_v4 = vmul.f32 %v2331_v37, %v3477_v49  ;;  %v688_v11 = vmul.f32 %v2331_v37, %v3470_v3 }
 0x2bb   :  { %v493_v29 = vadd.f32 %v485_v50, %v471_v22  ;;  %v494_v31 = vadd.f32 %v486_v25, %v472_v34  ;;  %v512_v9 = vadd.f32 %v504_v13, %v492_v26 }
 0x2bd   :  { %v2462_v32 = vpack.c.bf16 %v512_v9, %v511_v19  ;;  %v513_v35 = vadd.f32 %v505_v27, %v493_v29  ;;  %v514_v36 = vadd.f32 %v506_v28, %v494_v31 }
 0x2bf   :  { %2620 = vmatprep.mubr.bf16.mxu1 %v2462_v32  ;;  %v2463_v20 = vpack.c.bf16 %v514_v36, %v513_v35 }
 0x2c2   :  { %2621 = vmatmul.mubr.bf16.gmra.mrb[4].mxu1 %v2463_v20 }
 0x38d   :  { %v2618_v39 = vpop.f32.mrb[0].mxu1 }
 0x38e   :  { %v3492_v21 = vadd.f32 %v2618_v39, %v685_v38  ;;  %v645_v41 = vpop.f32.mrb[1].mxu1 }
 0x38f   :  { %v3495_v42 = vadd.f32 %v683_v40, %v645_v41  ;;  %v2619_v45 = vpop.f32.mrb[2].mxu1 }
 0x390   :  { %v701_v47 = vmul.f32 %v3492_v21, %v3492_v21  ;;  %v3500_v48 = vadd.f32 %v2619_v45, %v686_v30  ;;  %v648_v51 = vpop.f32.mrb[3].mxu1 }
 0x391   :  { %v699_v24 = vmul.f32 %v3495_v42, %v3495_v42  ;;  %v3504_v52 = vadd.f32 %v684_v46, %v648_v51 }
 0x392   :  { %v709_v53 = vmul.f32 %v701_v47, %v3492_v21  ;;  %v702_v59 = vmul.f32 %v3500_v48, %v3500_v48 }
 0x393   :  { %v707_v54 = vmul.f32 %v699_v24, %v3495_v42  ;;  %v700_v23 = vmul.f32 %v3504_v52, %v3504_v52 }
 0x394   :  { %v717_v55 = vmul.f32 0.044715, %v709_v53  ;;  %v710_v33 = vmul.f32 %v702_v59, %v3500_v48 }
 0x395   :  { %v715_v57 = vmul.f32 0.044715, %v707_v54  ;;  %v708_v58 = vmul.f32 %v700_v23, %v3504_v52  ;;  %v2622_v60 = vpop.f32.mrb[4].mxu1 }
 0x396   :  { %v725_v62 = vadd.f32 %v717_v55, %v3492_v21  ;;  %v718_v34 = vmul.f32 0.044715, %v710_v33  ;;  %v3517_v43 = vadd.f32 %v2622_v60, %v689_v56  ;;  %v661_v63 = vpop.f32.mrb[5].mxu1 }
 0x397   :  { %v723_v5 = vadd.f32 %v715_v57, %v3495_v42  ;;  %v716_v8 = vmul.f32 0.044715, %v708_v58  ;;  %v3521_v44 = vadd.f32 %v687_v61, %v661_v63  ;;  %v2623_v10 = vpop.f32.mrb[6].mxu1 }
 0x398   :  { %v733_v12 = vmul.f32 0.7978846, %v725_v62  ;;  %v726_v13 = vadd.f32 %v718_v34, %v3500_v48  ;;  %v705_v1 = vmul.f32 %v3517_v43, %v3517_v43  ;;  %v3527_v50 = vadd.f32 %v2623_v10, %v690_v4  ;;  %v664_v17 = vpop.f32.mrb[7].mxu1 }
 0x399   :  { %v731_v19 = vmul.f32 0.7978846, %v723_v5  ;;  %v724_v49 = vadd.f32 %v716_v8, %v3504_v52  ;;  %v703_v22 = vmul.f32 %v3521_v44, %v3521_v44  ;;  %v3532_v25 = vadd.f32 %v688_v11, %v664_v17 }
 0x39a   :  { %2863 = vtanh.f32 %v733_v12  ;;  %v734_v26 = vmul.f32 0.7978846, %v726_v13  ;;  %v713_v3 = vmul.f32 %v705_v1, %v3517_v43  ;;  %v706_v27 = vmul.f32 %v3527_v50, %v3527_v50 }
 0x39b   :  { %2865 = vtanh.f32 %v731_v19  ;;  %v732_v28 = vmul.f32 0.7978846, %v724_v49  ;;  %v711_v29 = vmul.f32 %v703_v22, %v3521_v44  ;;  %v704_v31 = vmul.f32 %v3532_v25, %v3532_v25 }
 0x39c   :  { %2867 = vtanh.f32 %v734_v26  ;;  %v721_v9 = vmul.f32 0.044715, %v713_v3  ;;  %v714_v32 = vmul.f32 %v706_v27, %v3527_v50  ;;  %v2931_v3 = vld [vmem:[%s3957_s0 + $0x20] sm:$0xff] }
 0x39d   :  { %2869 = vtanh.f32 %v732_v28  ;;  %v719_v35 = vmul.f32 0.044715, %v711_v29  ;;  %v712_v36 = vmul.f32 %v704_v31, %v3532_v25 }
 0x39e   :  { %v729_v20 = vadd.f32 %v721_v9, %v3517_v43  ;;  %v722_v37 = vmul.f32 0.044715, %v714_v32 }
 0x39f   :  { %v727_v38 = vadd.f32 %v719_v35, %v3521_v44  ;;  %v720_v39 = vmul.f32 0.044715, %v712_v36 }
 0x3a0   :  { %v737_v40 = vmul.f32 0.7978846, %v729_v20  ;;  %v730_v41 = vadd.f32 %v722_v37, %v3527_v50 }
 0x3a1   :  { %v735_v30 = vmul.f32 0.7978846, %v727_v38  ;;  %v728_v45 = vadd.f32 %v720_v39, %v3532_v25 }
 0x3a2   :  { %2871 = vtanh.f32 %v737_v40  ;;  %v738_v46 = vmul.f32 0.7978846, %v730_v41 }
 0x3a3   :  { %2873 = vtanh.f32 %v735_v30  ;;  %v736_v47 = vmul.f32 0.7978846, %v728_v45 }
 0x3a4   :  { %v2864_v51 = vpop.eup %2863  ;;  %2875 = vtanh.f32 %v738_v46 }
 0x3a5   :  { %v2866_v24 = vpop.eup %2865  ;;  %2877 = vtanh.f32 %v736_v47  ;;  %v749_v53 = vadd.f32 1.0, %v2864_v51 }
 0x3a6   :  { %v2868_v59 = vpop.eup %2867  ;;  %v747_v54 = vadd.f32 1.0, %v2866_v24 }
 0x3a7   :  { %v2870_v23 = vpop.eup %2869  ;;  %v750_v55 = vadd.f32 1.0, %v2868_v59  ;;  %v757_v57 = vmul.f32 0.5, %v749_v53 }
 0x3a8   :  { %v755_v33 = vmul.f32 0.5, %v747_v54  ;;  %v748_v56 = vadd.f32 1.0, %v2870_v23 }
 0x3a9   :  { %v758_v61 = vmul.f32 0.5, %v750_v55  ;;  %v765_v4 = vmul.f32 %v757_v57, %v3492_v21 }
 0x3aa   :  { %v763_v58 = vmul.f32 %v755_v33, %v3495_v42  ;;  %v756_v60 = vmul.f32 0.5, %v748_v56 }
 0x3ab   :  { %v766_v42 = vmul.f32 %v758_v61, %v3500_v48 }
 0x3ac   :  { %v2872_v62 = vpop.eup %2871  ;;  %v3548_v34 = vadd.f32 %v763_v58, %v3344_v0  ;;  %v764_v63 = vmul.f32 %v756_v60, %v3504_v52  ;;  %v2929_v0 = vld [vmem:[%s3957_s0 + $0x10] sm:$0xff] }
 0x3ad   :  { %v2874_v5 = vpop.eup %2873  ;;  %v753_v8 = vadd.f32 1.0, %v2872_v62  ;;  %v3561_v21 = vadd.f32 %v2929_v0, %v765_v4 }
 0x3ae   :  { %v2876_v10 = vpop.eup %2875  ;;  %779 = vadd.xlane.f32.xlu0 %v3548_v34  ;;  %v3554_v11 = vadd.f32 %v764_v63, %v3353_v2  ;;  %v751_v12 = vadd.f32 1.0, %v2874_v5  ;;  %v2930_v2 = vld [vmem:[%s3957_s0 + $0x18] sm:$0xff] }
 0x3af   :  { %v2878_v13 = vpop.eup %2877  ;;  %v754_v1 = vadd.f32 1.0, %v2876_v10  ;;  %v761_v19 = vmul.f32 0.5, %v753_v8  ;;  %v3567_v48 = vadd.f32 %v2930_v2, %v766_v42  ;;  %v2770_v2 = vld [vmem:[%s3961_s4 + $0x58] sm:$0xff]  }
 0x3b0   :  { %781 = vadd.xlane.f32.xlu1 %v3554_v11  ;;  %v759_v52 = vmul.f32 0.5, %v751_v12  ;;  %v752_v17 = vadd.f32 1.0, %v2878_v13 }
 0x3b1   :  { %v762_v26 = vmul.f32 0.5, %v754_v1  ;;  %v769_v29 = vmul.f32 %v761_v19, %v3517_v43  ;;  %v2767_v43 = vld [vmem:[%s3961_s4 + $0x40] sm:$0xff]   ;;  %v2769_v19 = vld [vmem:[%s3961_s4 + $0x50] sm:$0xff]  }
 0x3b2   :  { %783 = vadd.xlane.f32.xlu0 %v3561_v21  ;;  %v767_v49 = vmul.f32 %v759_v52, %v3521_v44  ;;  %v760_v22 = vmul.f32 0.5, %v752_v17  ;;  %v2932_v44 = vld [vmem:[%s3957_s0 + $0x28] sm:$0xff]  ;;  %2624 = vmatprep.subr.bf16.mxu0 %v2767_v43 }
 0x3b3   :  { %v770_v9 = vmul.f32 %v762_v26, %v3527_v50  ;;  %v3587_v32 = vadd.f32 %v769_v29, %v3368_v6  ;;  %2625 = vmatpush3.bf16.msra.mxu0 %v2767_v43  ;;  %v2768_v17 = vld [vmem:[%s3961_s4 + $0x48] sm:$0xff]   ;;  %v2773_v26 = vld [vmem:[%s3961_s4 + $0x70] sm:$0xff]  }
 0x3b4   :  { %785 = vadd.xlane.f32.xlu1 %v3567_v48  ;;  %v3574_v27 = vadd.f32 %v2931_v3, %v767_v49  ;;  %v768_v28 = vmul.f32 %v760_v22, %v3532_v25  ;;  %2626 = vmatprep.subr.bf16.mxu0 %v2768_v17  ;;  %v2771_v49 = vld [vmem:[%s3961_s4 + $0x60] sm:$0xff]   ;;  %v2772_v22 = vld [vmem:[%s3961_s4 + $0x68] sm:$0xff]   ;;  %v2774_v3 = vld [vmem:[%s3961_s4 + $0x78] sm:$0xff]  }
 0x3b5   :  { %v3591_v25 = vadd.f32 %v770_v9, %v3373_v7  ;;  %v2776_v29 = vld [vmem:[#allocation7 + $0x48] sm:$0xff]   ;;  %v2778_v9 = vld [vmem:[#allocation7 + $0x58] sm:$0xff]   ;;  %v2779_v43 = vld [vmem:[#allocation7 + $0x60] sm:$0xff]  }
 0x3b6   :  { %787 = vadd.xlane.f32.xlu0 %v3574_v27  ;;  %v3582_v31 = vadd.f32 %v2932_v44, %v768_v28  ;;  %v2775_v28 = vld [vmem:[#allocation7 + $0x40] sm:$0xff]   ;;  %v2777_v44 = vld [vmem:[#allocation7 + $0x50] sm:$0xff]  }
 0x3b7   :  { %2627 = vmatpush3.bf16.msra.mxu0 %v2768_v17  ;;  %2648 = vmatprep.subr.bf16.mxu1 %v2775_v28 }
 0x3b8   :  { %789 = vadd.xlane.f32.xlu1 %v3582_v31  ;;  %2628 = vmatprep.subr.bf16.mxu0 %v2769_v19 }
 0x3b9   :  { %2649 = vmatpush3.bf16.msra.mxu1 %v2775_v28 }
 0x3ba   :  { %791 = vadd.xlane.f32.xlu0 %v3587_v32  ;;  %2650 = vmatprep.subr.bf16.mxu1 %v2776_v29 }
 0x3bb   :  { %2629 = vmatpush3.bf16.msra.mxu0 %v2769_v19 }
 0x3bc   :  { %793 = vadd.xlane.f32.xlu1 %v3591_v25  ;;  %2630 = vmatprep.subr.bf16.mxu0 %v2770_v2 }
 0x3bd   :  { %2651 = vmatpush3.bf16.msra.mxu1 %v2776_v29 }
 0x3be   :  { %2652 = vmatprep.subr.bf16.mxu1 %v2777_v44 }
 0x3bf   :  { %2631 = vmatpush3.bf16.msra.mxu0 %v2770_v2 }
 0x3c0   :  { %2632 = vmatprep.subr.bf16.mxu0 %v2771_v49 }
 0x3c1   :  { %2653 = vmatpush3.bf16.msra.mxu1 %v2777_v44 }
 0x3c2   :  { %2654 = vmatprep.subr.bf16.mxu1 %v2778_v9 }
 0x3c3   :  { %2633 = vmatpush3.bf16.msra.mxu0 %v2771_v49 }
 0x3c4   :  { %2634 = vmatprep.subr.bf16.mxu0 %v2772_v22 }
 0x3c5   :  { %2655 = vmatpush3.bf16.msra.mxu1 %v2778_v9 }
 0x3c6   :  { %2656 = vmatprep.subr.bf16.mxu1 %v2779_v43 }
 0x3c7   :  { %2635 = vmatpush3.bf16.msra.mxu0 %v2772_v22 }
 0x3c8   :  { %2636 = vmatprep.subr.bf16.mxu0 %v2773_v26 }
 0x3c9   :  { %2657 = vmatpush3.bf16.msra.mxu1 %v2779_v43 }
 0x3cb   :  { %2637 = vmatpush3.bf16.msra.mxu0 %v2773_v26 }
 0x3cc   :  { %2638 = vmatprep.subr.bf16.mxu0 %v2774_v3 }
 0x3cf   :  { %2639 = vmatpush3.bf16.msra.mxu0 %v2774_v3 }
 0x43b   :  { %v780_v35 = vpop.xlane.xlu0 %779 }
 0x43c   :  { %v795_v50 = vmul.f32 0.05, %v780_v35 }
 0x43d   :  { %v782_v36 = vpop.xlane.xlu1 %781 }
 0x43e   :  { %v803_v20 = vsub.f32 %v3548_v34, %v795_v50  ;;  %v796_v6 = vmul.f32 0.05, %v782_v36 }
 0x43f   :  { %v784_v37 = vpop.xlane.xlu0 %783 }
 0x440   :  { %v804_v38 = vsub.f32 %v3554_v11, %v796_v6  ;;  %v797_v39 = vmul.f32 0.05, %v784_v37  ;;  %v3600_v7 = vmul.f32 %v3382_v16, %v803_v20 }
 0x441   :  { %v786_v40 = vpop.xlane.xlu1 %785 }
 0x442   :  { %v805_v41 = vsub.f32 %v3561_v21, %v797_v39  ;;  %v798_v30 = vmul.f32 0.05, %v786_v40  ;;  %v819_v45 = vmul.f32 %v3600_v7, %v3600_v7  ;;  %v3606_v46 = vmul.f32 %v3382_v16, %v804_v38 }
 0x443   :  { %v788_v47 = vpop.xlane.xlu0 %787 }
 0x444   :  { %v806_v51 = vsub.f32 %v3567_v48, %v798_v30  ;;  %v799_v24 = vmul.f32 0.05, %v788_v47  ;;  %827 = vadd.xlane.f32.xlu0 %v819_v45  ;;  %v820_v53 = vmul.f32 %v3606_v46, %v3606_v46  ;;  %v3612_v59 = vmul.f32 %v3382_v16, %v805_v41 }
 0x445   :  { %v790_v54 = vpop.xlane.xlu1 %789 }
 0x446   :  { %v807_v23 = vsub.f32 %v3574_v27, %v799_v24  ;;  %v800_v55 = vmul.f32 0.05, %v790_v54  ;;  %829 = vadd.xlane.f32.xlu1 %v820_v53  ;;  %v821_v33 = vmul.f32 %v3612_v59, %v3612_v59  ;;  %v3618_v56 = vmul.f32 %v3382_v16, %v806_v51 }
 0x447   :  { %v792_v57 = vpop.xlane.xlu0 %791 }
 0x448   :  { %v808_v58 = vsub.f32 %v3582_v31, %v800_v55  ;;  %v801_v60 = vmul.f32 0.05, %v792_v57  ;;  %831 = vadd.xlane.f32.xlu0 %v821_v33  ;;  %v822_v61 = vmul.f32 %v3618_v56, %v3618_v56  ;;  %v3624_v62 = vmul.f32 %v3382_v16, %v807_v23 }
 0x449   :  { %v794_v63 = vpop.xlane.xlu1 %793 }
 0x44a   :  { %v809_v4 = vsub.f32 %v3587_v32, %v801_v60  ;;  %v802_v5 = vmul.f32 0.05, %v794_v63  ;;  %833 = vadd.xlane.f32.xlu1 %v822_v61  ;;  %v823_v8 = vmul.f32 %v3624_v62, %v3624_v62  ;;  %v3630_v10 = vmul.f32 %v3382_v16, %v808_v58  ;;  %v2332_v60 = vld [vmem:[#allocation2 + $0x1] ss:$0 sm:$0xff] }
 0x44c   :  { %v810_v42 = vsub.f32 %v3591_v25, %v802_v5  ;;  %835 = vadd.xlane.f32.xlu0 %v823_v8  ;;  %v824_v12 = vmul.f32 %v3630_v10, %v3630_v10  ;;  %v3636_v13 = vmul.f32 %v3382_v16, %v809_v4 }
 0x44e   :  { %837 = vadd.xlane.f32.xlu1 %v824_v12  ;;  %v825_v1 = vmul.f32 %v3636_v13, %v3636_v13  ;;  %v3641_v0 = vmul.f32 %v3382_v16, %v810_v42 }
 0x450   :  { %839 = vadd.xlane.f32.xlu0 %v825_v1  ;;  %v826_v52 = vmul.f32 %v3641_v0, %v3641_v0 }
 0x452   :  { %841 = vadd.xlane.f32.xlu1 %v826_v52  ;;  %v2333_v52 = vld [vmem:[#allocation4 + $0x1] ss:$0 sm:$0xff] }
 0x4d1   :  { %v828_v35 = vpop.xlane.xlu0 %827 }
 0x4d2   :  { %v843_v50 = vmul.f32 0.05, %v828_v35 }
 0x4d3   :  { %v830_v36 = vpop.xlane.xlu1 %829 }
 0x4d4   :  { %v851_v20 = vadd.f32 1e-05, %v843_v50  ;;  %v844_v6 = vmul.f32 0.05, %v830_v36 }
 0x4d5   :  { %v832_v37 = vpop.xlane.xlu0 %831 }
 0x4d6   :  { %2879 = vrsqrt.f32 %v851_v20  ;;  %v852_v38 = vadd.f32 1e-05, %v844_v6  ;;  %v845_v39 = vmul.f32 0.05, %v832_v37 }
 0x4d7   :  { %v834_v40 = vpop.xlane.xlu1 %833 }
 0x4d8   :  { %2881 = vrsqrt.f32 %v852_v38  ;;  %v853_v41 = vadd.f32 1e-05, %v845_v39  ;;  %v846_v30 = vmul.f32 0.05, %v834_v40 }
 0x4d9   :  { %v836_v45 = vpop.xlane.xlu0 %835 }
 0x4da   :  { %2883 = vrsqrt.f32 %v853_v41  ;;  %v854_v47 = vadd.f32 1e-05, %v846_v30  ;;  %v847_v51 = vmul.f32 0.05, %v836_v45  ;;  %v2780_v45 = vld [vmem:[#allocation7 + $0x68] sm:$0xff]  }
 0x4db   :  { %v838_v24 = vpop.xlane.xlu1 %837  ;;  %2658 = vmatprep.subr.bf16.mxu1 %v2780_v45 }
 0x4dc   :  { %2885 = vrsqrt.f32 %v854_v47  ;;  %v855_v53 = vadd.f32 1e-05, %v847_v51  ;;  %v848_v54 = vmul.f32 0.05, %v838_v24  ;;  %2659 = vmatpush3.bf16.msra.mxu1 %v2780_v45  ;;  %v2781_v47 = vld [vmem:[#allocation7 + $0x70] sm:$0xff]  }
 0x4dd   :  { %v840_v23 = vpop.xlane.xlu0 %839  ;;  %2660 = vmatprep.subr.bf16.mxu1 %v2781_v47  ;;  %v1070_v51 = vld [vmem:[#allocation6 + $0x1] sm:$0x1] }
 0x4de   :  { %2887 = vrsqrt.f32 %v855_v53  ;;  %v856_v55 = vadd.f32 1e-05, %v848_v54  ;;  %v849_v33 = vmul.f32 0.05, %v840_v23  ;;  %v1093_v24 = vmul.f32 %v1070_v51, %v1070_v51 }
 0x4df   :  { %v842_v57 = vpop.xlane.xlu1 %841  ;;  %v1075_v53 = vrot.slane %v1070_v51, %v3485_v18 }
 0x4e0   :  { %v2880_v58 = vpop.eup %2879  ;;  %2889 = vrsqrt.f32 %v856_v55  ;;  %v857_v61 = vadd.f32 1e-05, %v849_v33  ;;  %v850_v63 = vmul.f32 0.05, %v842_v57  ;;  %2661 = vmatpush3.bf16.msra.mxu1 %v2781_v47  ;;  %v1098_v54 = vrot.slane %v1093_v24, %v3485_v18 }
 0x4e1   :  { %v867_v4 = vmul.f32 %v2880_v58, %v3600_v7  ;;  %v1115_v23 = vmul.f32 %v1093_v24, %v1093_v24  ;;  %v1077_v55 = vmul.f32 0.0, %v1075_v53 }
 0x4e2   :  { %v2882_v5 = vpop.eup %2881  ;;  %2891 = vrsqrt.f32 %v857_v61  ;;  %v858_v8 = vadd.f32 1e-05, %v850_v63 }
 0x4e3   :  { %v868_v42 = vmul.f32 %v2882_v5, %v3606_v46  ;;  %v883_v12 = vmul.f32 %v2332_v60, %v867_v4  ;;  %v1120_v61 = vrot.slane %v1115_v23, %v3485_v18 }
 0x4e4   :  { %v2884_v1 = vpop.eup %2883  ;;  %2893 = vrsqrt.f32 %v858_v8 }
 0x4e5   :  { %v869_v17 = vmul.f32 %v2884_v1, %v3612_v59  ;;  %v884_v19 = vmul.f32 %v2332_v60, %v868_v42  ;;  %v3670_v26 = vadd.f32 %v2333_v52, %v883_v12 }
 0x4e6   :  { %v2886_v2 = vpop.eup %2885 }
 0x4e7   :  { %v885_v49 = vmul.f32 %v2332_v60, %v869_v17  ;;  %v870_v22 = vmul.f32 %v2886_v2, %v3618_v56  ;;  %v3672_v3 = vadd.f32 %v2333_v52, %v884_v19  ;;  %v1122_v17 = vmul.f32 0.0, %v1120_v61 }
 0x4e8   :  { %v2888_v7 = vpop.eup %2887 }
 0x4e9   :  { %v886_v28 = vmul.f32 %v2332_v60, %v870_v22  ;;  %v2464_v46 = vpack.c.bf16 %v3672_v3, %v3670_v26  ;;  %v871_v29 = vmul.f32 %v2888_v7, %v3624_v62  ;;  %v3677_v9 = vadd.f32 %v2333_v52, %v885_v49 }
 0x4ea   :  { %v2890_v44 = vpop.eup %2889 }
 0x4eb   :  { %2640 = vmatprep.mubr.bf16.mxu0 %v2464_v46  ;;  %v3679_v59 = vadd.f32 %v2333_v52, %v886_v28  ;;  %v872_v43 = vmul.f32 %v2890_v44, %v3630_v10  ;;  %v887_v56 = vmul.f32 %v2332_v60, %v871_v29 }
 0x4ec   :  { %v2892_v35 = vpop.eup %2891 }
 0x4ed   :  { %v2465_v50 = vpack.c.bf16 %v3679_v59, %v3677_v9  ;;  %v888_v36 = vmul.f32 %v2332_v60, %v872_v43  ;;  %v873_v20 = vmul.f32 %v2892_v35, %v3636_v13  ;;  %v3685_v37 = vadd.f32 %v2333_v52, %v887_v56 }
 0x4ee   :  { %v2894_v6 = vpop.eup %2893 }
 0x4ef   :  { %2641 = vmatmul.mubr.bf16.vlgmr.msra.gmra.mrb[8].mxu0 %v2465_v50  ;;  %v3687_v62 = vadd.f32 %v2333_v52, %v888_v36  ;;  %v874_v38 = vmul.f32 %v2894_v6, %v3641_v0  ;;  %v889_v39 = vmul.f32 %v2332_v60, %v873_v20  ;;  %v2782_v0 = vld [vmem:[#allocation7 + $0x78] sm:$0xff]  }
 0x4f0   :  { %2662 = vmatprep.subr.bf16.mxu1 %v2782_v0 }
 0x4f1   :  { %v2466_v10 = vpack.c.bf16 %v3687_v62, %v3685_v37  ;;  %v890_v40 = vmul.f32 %v2332_v60, %v874_v38  ;;  %v3692_v41 = vadd.f32 %v2333_v52, %v889_v39  ;;  %2663 = vmatpush3.bf16.msra.mxu1 %v2782_v0  ;;  %v1100_v60 = vmul.f32 0.0, %v1098_v54 }
 0x4f2   :  { %2696 = vmatprep.subr.bf16.mxu1 %v3131_v15 }
 0x4f3   :  { %2644 = vmatprep.mubr.bf16.mxu0 %v2466_v10  ;;  %v3694_v30 = vadd.f32 %v2333_v52, %v890_v40 }
 0x4f5   :  { %v2467_v13 = vpack.c.bf16 %v3694_v30, %v3692_v41 }
 0x4f7   :  { %2645 = vmatmul.mubr.bf16.gmra.mrb[12].mxu0 %v2467_v13 }
 0x5c2   :  { %v2642_v33 = vpop.f32.mrb[8].mxu0 }
 0x5c3   :  { %v1080_v57 = vmul.f32 %v2642_v33, %v1075_v53  ;;  %v1038_v58 = vpop.f32.mrb[9].mxu0 }
 0x5c4   :  { %v1078_v63 = vmul.f32 %v1075_v53, %v1038_v58  ;;  %v1085_v4 = vadd.f32 %v1077_v55, %v1038_v58  ;;  %v2643_v5 = vpop.f32.mrb[10].mxu0 }
 0x5c5   :  { %v1088_v8 = vadd.f32 %v2643_v5, %v1080_v57  ;;  %v1041_v42 = vpop.f32.mrb[11].mxu0  ;;  %v1081_v44 = vmul.f32 %v2643_v5, %v1075_v53 }
 0x5c6   :  { %v1079_v12 = vmul.f32 %v1075_v53, %v1041_v42  ;;  %v1086_v1 = vadd.f32 %v1078_v63, %v1041_v42  ;;  %v1107_v52 = vadd.f32 %v1100_v60, %v1085_v4  ;;  %v1101_v19 = vmul.f32 %v1098_v54, %v1085_v4 }
 0x5c7   :  { %v1104_v51 = vmul.f32 %v1098_v54, %v1088_v8 }
 0x5c8   :  { %v1087_v2 = vadd.f32 %v2642_v33, %v1079_v12  ;;  %v1102_v49 = vmul.f32 %v1098_v54, %v1086_v1  ;;  %v1108_v22 = vadd.f32 %v1100_v60, %v1086_v1  ;;  %v1127_v29 = vadd.f32 %v1122_v17, %v1107_v52 }
 0x5c9   :  { %v1123_v0 = vmul.f32 %v1120_v61, %v1107_v52  ;;  %v2374_v52 = vld [vmem:[#allocation9 + $0x1] ss:$0 sm:$0xff] }
 0x5ca   :  { %v1109_v7 = vadd.f32 %v1101_v19, %v1087_v2  ;;  %v1110_v28 = vadd.f32 %v1102_v49, %v1088_v8  ;;  %v2646_v46 = vpop.f32.mrb[12].mxu0  ;;  %v1128_v43 = vadd.f32 %v1122_v17, %v1108_v22  ;;  %v1103_v20 = vmul.f32 %v1098_v54, %v1087_v2 }
 0x5cb   :  { %v1084_v56 = vmul.f32 %v2646_v46, %v1075_v53  ;;  %v1054_v35 = vpop.f32.mrb[13].mxu0  ;;  %v1124_v57 = vmul.f32 %v1120_v61, %v1108_v22  ;;  %v1307_v2 = vmul.f32 %v2374_v52, %v3677_v9  ;;  %v1305_v22 = vmul.f32 %v2374_v52, %v3670_v26 }
 0x5cc   :  { %v1129_v50 = vadd.f32 %v1122_v17, %v1109_v7  ;;  %v1130_v36 = vadd.f32 %v1122_v17, %v1110_v28  ;;  %v2647_v6 = vpop.f32.mrb[14].mxu0  ;;  %v1082_v38 = vmul.f32 %v1075_v53, %v1054_v35  ;;  %v1089_v39 = vadd.f32 %v1081_v44, %v1054_v35 }
 0x5cd   :  { %v1092_v10 = vadd.f32 %v2647_v6, %v1084_v56  ;;  %v1057_v40 = vpop.f32.mrb[15].mxu0  ;;  %v2468_v13 = vpack.c.bf16 %v1128_v43, %v1127_v29  ;;  %v1125_v4 = vmul.f32 %v1120_v61, %v1109_v7  ;;  %v1126_v42 = vmul.f32 %v1120_v61, %v1110_v28 }
 0x5ce   :  { %v2469_v45 = vpack.c.bf16 %v1130_v36, %v1129_v50  ;;  %v1083_v47 = vmul.f32 %v1075_v53, %v1057_v40  ;;  %v1111_v24 = vadd.f32 %v1103_v20, %v1089_v39  ;;  %v1090_v23 = vadd.f32 %v1082_v38, %v1057_v40 }
 0x5cf   :  { %2664 = vmatprep.mubr.bf16.mxu1 %v2468_v13  ;;  %v1105_v55 = vmul.f32 %v1098_v54, %v1089_v39  ;;  %v1308_v7 = vmul.f32 %v2374_v52, %v3679_v59  ;;  %v1306_v29 = vmul.f32 %v2374_v52, %v3672_v3  ;;  %v1311_v39 = vmul.f32 %v2374_v52, %v3692_v41 }
 0x5d0   :  { %v1091_v33 = vadd.f32 %v2646_v46, %v1083_v47  ;;  %2665 = vmatmul.mubr.bf16.vlgmr.msra.gmra.mrb[8].mxu1 %v2469_v45  ;;  %v1131_v58 = vadd.f32 %v1123_v0, %v1111_v24  ;;  %v1106_v60 = vmul.f32 %v1098_v54, %v1090_v23  ;;  %v1112_v63 = vadd.f32 %v1104_v51, %v1090_v23 }
 0x5d1   :  { %v1309_v45 = vmul.f32 %v2374_v52, %v3685_v37  ;;  %v1312_v23 = vmul.f32 %v2374_v52, %v3694_v30 }
 0x5d2   :  { %v1113_v5 = vadd.f32 %v1105_v55, %v1091_v33  ;;  %v1114_v12 = vadd.f32 %v1106_v60, %v1092_v10  ;;  %v1132_v1 = vadd.f32 %v1124_v57, %v1112_v63 }
 0x5d4   :  { %v1133_v17 = vadd.f32 %v1125_v4, %v1113_v5  ;;  %v2470_v19 = vpack.c.bf16 %v1132_v1, %v1131_v58  ;;  %v1134_v53 = vadd.f32 %v1126_v42, %v1114_v12  ;;  %v1310_v58 = vmul.f32 %v2374_v52, %v3687_v62 }
 0x5d6   :  { %2668 = vmatprep.mubr.bf16.mxu1 %v2470_v19  ;;  %v2471_v8 = vpack.c.bf16 %v1134_v53, %v1133_v17 }
 0x5d8   :  { %2669 = vmatmul.mubr.bf16.gmra.mrb[12].mxu1 %v2471_v8 }
 0x5d9   :  { %2712 = vmatprep.mubr.msk.bf16.mxu1 %vm3132_vm1, %v3131_v15 }
 0x6a3   :  { %v2666_v49 = vpop.f32.mrb[8].mxu1 }
 0x6a4   :  { %v3704_v46 = vadd.f32 %v2666_v49, %v1307_v2  ;;  %v1266_v54 = vpop.f32.mrb[9].mxu1 }
 0x6a5   :  { %v3707_v61 = vadd.f32 %v1305_v22, %v1266_v54  ;;  %v2667_v28 = vpop.f32.mrb[10].mxu1 }
 0x6a6   :  { %v1323_v44 = vmul.f32 %v3704_v46, %v3704_v46  ;;  %v3712_v43 = vadd.f32 %v2667_v28, %v1308_v7  ;;  %v1269_v56 = vpop.f32.mrb[11].mxu1 }
 0x6a7   :  { %v1321_v9 = vmul.f32 %v3707_v61, %v3707_v61  ;;  %v3716_v26 = vadd.f32 %v1306_v29, %v1269_v56 }
 0x6a8   :  { %v1331_v35 = vmul.f32 %v1323_v44, %v3704_v46  ;;  %v1324_v59 = vmul.f32 %v3712_v43, %v3712_v43 }
 0x6a9   :  { %v1329_v50 = vmul.f32 %v1321_v9, %v3707_v61  ;;  %v1322_v3 = vmul.f32 %v3716_v26, %v3716_v26 }
 0x6aa   :  { %v1339_v36 = vmul.f32 0.044715, %v1331_v35  ;;  %v1332_v20 = vmul.f32 %v1324_v59, %v3712_v43 }
 0x6ab   :  { %v1337_v6 = vmul.f32 0.044715, %v1329_v50  ;;  %v1330_v38 = vmul.f32 %v1322_v3, %v3716_v26  ;;  %v2670_v13 = vpop.f32.mrb[12].mxu1 }
 0x6ac   :  { %v1347_v10 = vadd.f32 %v1339_v36, %v3704_v46  ;;  %v1340_v40 = vmul.f32 0.044715, %v1332_v20  ;;  %v3730_v51 = vadd.f32 %v2670_v13, %v1311_v39  ;;  %v1282_v24 = vpop.f32.mrb[13].mxu1 }
 0x6ad   :  { %v1345_v47 = vadd.f32 %v1337_v6, %v3707_v61  ;;  %v1338_v0 = vmul.f32 0.044715, %v1330_v38  ;;  %v3734_v57 = vadd.f32 %v1309_v45, %v1282_v24  ;;  %v2671_v41 = vpop.f32.mrb[14].mxu1 }
 0x6ae   :  { %v1355_v55 = vmul.f32 0.7978846, %v1347_v10  ;;  %v1348_v33 = vadd.f32 %v1340_v40, %v3712_v43  ;;  %v1327_v37 = vmul.f32 %v3730_v51, %v3730_v51  ;;  %v3740_v4 = vadd.f32 %v2671_v41, %v1312_v23  ;;  %v1285_v5 = vpop.f32.mrb[15].mxu1 }
 0x6af   :  { %v1353_v60 = vmul.f32 0.7978846, %v1345_v47  ;;  %v1346_v63 = vadd.f32 %v1338_v0, %v3716_v26  ;;  %v1325_v30 = vmul.f32 %v3734_v57, %v3734_v57  ;;  %v3744_v12 = vadd.f32 %v1310_v58, %v1285_v5 }
 0x6b0   :  { %v1356_v42 = vmul.f32 0.7978846, %v1348_v33  ;;  %2895 = vtanh.f32 %v1355_v55  ;;  %v1335_v17 = vmul.f32 %v1327_v37, %v3730_v51  ;;  %v1328_v62 = vmul.f32 %v3740_v4, %v3740_v4 }
 0x6b1   :  { %v1354_v1 = vmul.f32 0.7978846, %v1346_v63  ;;  %2897 = vtanh.f32 %v1353_v60  ;;  %v1333_v19 = vmul.f32 %v1325_v30, %v3734_v57  ;;  %v1326_v53 = vmul.f32 %v3744_v12, %v3744_v12 }
 0x6b2   :  { %2899 = vtanh.f32 %v1356_v42  ;;  %v1343_v8 = vmul.f32 0.044715, %v1335_v17  ;;  %v1336_v52 = vmul.f32 %v1328_v62, %v3740_v4 }
 0x6b3   :  { %2901 = vtanh.f32 %v1354_v1  ;;  %v1341_v2 = vmul.f32 0.044715, %v1333_v19  ;;  %v1334_v49 = vmul.f32 %v1326_v53, %v3744_v12 }
 0x6b4   :  { %v1351_v22 = vadd.f32 %v1343_v8, %v3730_v51  ;;  %v1344_v54 = vmul.f32 0.044715, %v1336_v52 }
 0x6b5   :  { %v1349_v7 = vadd.f32 %v1341_v2, %v3734_v57  ;;  %v1342_v28 = vmul.f32 0.044715, %v1334_v49 }
 0x6b6   :  { %v1359_v29 = vmul.f32 0.7978846, %v1351_v22  ;;  %v1352_v44 = vadd.f32 %v1344_v54, %v3740_v4 }
 0x6b7   :  { %v1357_v56 = vmul.f32 0.7978846, %v1349_v7  ;;  %v1350_v9 = vadd.f32 %v1342_v28, %v3744_v12 }
 0x6b8   :  { %v1360_v35 = vmul.f32 0.7978846, %v1352_v44  ;;  %2903 = vtanh.f32 %v1359_v29 }
 0x6b9   :  { %v1358_v50 = vmul.f32 0.7978846, %v1350_v9  ;;  %2905 = vtanh.f32 %v1357_v56 }
 0x6ba   :  { %v2896_v59 = vpop.eup %2895  ;;  %2907 = vtanh.f32 %v1360_v35 }
 0x6bb   :  { %v2898_v3 = vpop.eup %2897  ;;  %v1371_v36 = vadd.f32 1.0, %v2896_v59  ;;  %2909 = vtanh.f32 %v1358_v50 }
 0x6bc   :  { %v2900_v20 = vpop.eup %2899  ;;  %v1369_v6 = vadd.f32 1.0, %v2898_v3 }
 0x6bd   :  { %v2902_v38 = vpop.eup %2901  ;;  %v1372_v39 = vadd.f32 1.0, %v2900_v20  ;;  %v1379_v13 = vmul.f32 0.5, %v1371_v36 }
 0x6be   :  { %v1377_v10 = vmul.f32 0.5, %v1369_v6  ;;  %v1370_v40 = vadd.f32 1.0, %v2902_v38 }
 0x6bf   :  { %v1380_v0 = vmul.f32 0.5, %v1372_v39  ;;  %v1387_v55 = vmul.f32 %v1379_v13, %v3704_v46 }
 0x6c0   :  { %v1385_v45 = vmul.f32 %v1377_v10, %v3707_v61  ;;  %v1378_v47 = vmul.f32 0.5, %v1370_v40 }
 0x6c1   :  { %v1388_v60 = vmul.f32 %v1380_v0, %v3712_v43  ;;  %v1395_v61 = vadd.f32 %v1387_v55, %v3561_v21 }
 0x6c2   :  { %v1393_v24 = vadd.f32 %v1385_v45, %v3548_v34  ;;  %v1386_v23 = vmul.f32 %v1378_v47, %v3716_v26  ;;  %v2904_v33 = vpop.eup %2903 }
 0x6c3   :  { %v2906_v41 = vpop.eup %2905  ;;  %v1375_v63 = vadd.f32 1.0, %v2904_v33  ;;  %v1396_v46 = vadd.f32 %v1388_v60, %v3567_v48 }
 0x6c4   :  { %1401 = vadd.xlane.f32.xlu0 %v1393_v24  ;;  %v1394_v58 = vadd.f32 %v1386_v23, %v3554_v11  ;;  %v2908_v37 = vpop.eup %2907  ;;  %v1373_v5 = vadd.f32 1.0, %v2906_v41 }
 0x6c5   :  { %v2910_v42 = vpop.eup %2909  ;;  %v1376_v30 = vadd.f32 1.0, %v2908_v37  ;;  %v1383_v26 = vmul.f32 0.5, %v1375_v63  ;;  %v2784_v37 = vld [vmem:[%s3961_s4 + $0x88] sm:$0xff]  }
 0x6c6   :  { %1403 = vadd.xlane.f32.xlu1 %v1394_v58  ;;  %v1381_v34 = vmul.f32 0.5, %v1373_v5  ;;  %v1374_v1 = vadd.f32 1.0, %v2910_v42  ;;  %v2785_v5 = vld [vmem:[%s3961_s4 + $0x90] sm:$0xff]   ;;  %v2787_v42 = vld [vmem:[%s3961_s4 + $0xa0] sm:$0xff]  }
 0x6c7   :  { %v1384_v11 = vmul.f32 0.5, %v1376_v30  ;;  %v1391_v53 = vmul.f32 %v1383_v26, %v3730_v51  ;;  %v2789_v30 = vld [vmem:[%s3961_s4 + $0xb0] sm:$0xff]  }
 0x6c8   :  { %1405 = vadd.xlane.f32.xlu0 %v1395_v61  ;;  %v1389_v17 = vmul.f32 %v1381_v34, %v3734_v57  ;;  %v1382_v62 = vmul.f32 0.5, %v1374_v1  ;;  %v2790_v34 = vld [vmem:[%s3961_s4 + $0xb8] sm:$0xff]   ;;  %v2791_v1 = vld [vmem:[#allocation7 + $0x80] sm:$0xff]  }
 0x6c9   :  { %v1392_v8 = vmul.f32 %v1384_v11, %v3740_v4  ;;  %v1399_v52 = vadd.f32 %v1391_v53, %v3587_v32  ;;  %2697 = vmatpush3.bf16.msra.mxu1 %v2791_v1  ;;  %v2792_v26 = vld [vmem:[#allocation7 + $0x88] sm:$0xff]  }
 0x6ca   :  { %1407 = vadd.xlane.f32.xlu1 %v1396_v46  ;;  %v1397_v43 = vadd.f32 %v1389_v17, %v3574_v27  ;;  %v1390_v19 = vmul.f32 %v1382_v62, %v3744_v12  ;;  %v2783_v27 = vld [vmem:[%s3961_s4 + $0x80] sm:$0xff]   ;;  %2698 = vmatprep.subr.bf16.mxu1 %v3131_v15 }
 0x6cb   :  { %v3774_v48 = vadd.f32 %v1392_v8, %v3591_v25  ;;  %2672 = vmatprep.subr.bf16.mxu0 %v2783_v27 }
 0x6cc   :  { %1409 = vadd.xlane.f32.xlu0 %v1397_v43  ;;  %v1398_v21 = vadd.f32 %v1390_v19, %v3582_v31  ;;  %2673 = vmatpush3.bf16.msra.mxu0 %v2783_v27 }
 0x6cd   :  { %2674 = vmatprep.subr.bf16.mxu0 %v2784_v37  ;;  %2699 = vmatpush3.bf16.msra.mxu1 %v2792_v26 }
 0x6ce   :  { %1411 = vadd.xlane.f32.xlu1 %v1398_v21  ;;  %2700 = vmatprep.subr.bf16.mxu1 %v3131_v15 }
 0x6d0   :  { %1413 = vadd.xlane.f32.xlu0 %v1399_v52  ;;  %2675 = vmatpush3.bf16.msra.mxu0 %v2784_v37 }
 0x6d1   :  { %2676 = vmatprep.subr.bf16.mxu0 %v2785_v5 }
 0x6d2   :  { %1415 = vadd.xlane.f32.xlu1 %v3774_v48 }
 0x6d4   :  { %2677 = vmatpush3.bf16.msra.mxu0 %v2785_v5 }
 0x751   :  { %v1402_v51 = vpop.xlane.xlu0 %1401 }
 0x752   :  { %v1417_v57 = vmul.f32 0.05, %v1402_v51 }
 0x753   :  { %v1404_v31 = vpop.xlane.xlu1 %1403 }
 0x754   :  { %v1425_v12 = vsub.f32 %v1393_v24, %v1417_v57  ;;  %v1418_v4 = vmul.f32 0.05, %v1404_v31 }
 0x755   :  { %v1406_v2 = vpop.xlane.xlu0 %1405 }
 0x756   :  { %v1426_v49 = vsub.f32 %v1394_v58, %v1418_v4  ;;  %v1419_v32 = vmul.f32 0.05, %v1406_v2  ;;  %v3781_v22 = vmul.f32 %v3382_v16, %v1425_v12 }
 0x757   :  { %v1408_v25 = vpop.xlane.xlu1 %1407 }
 0x758   :  { %v1427_v54 = vsub.f32 %v1395_v61, %v1419_v32  ;;  %v1420_v7 = vmul.f32 0.05, %v1408_v25  ;;  %v1441_v28 = vmul.f32 %v3781_v22, %v3781_v22  ;;  %v3786_v29 = vmul.f32 %v3382_v16, %v1426_v49  ;;  %v2788_v61 = vld [vmem:[%s3961_s4 + $0xa8] sm:$0xff]  }
 0x759   :  { %v1410_v56 = vpop.xlane.xlu0 %1409 }
 0x75a   :  { %v1428_v44 = vsub.f32 %v1396_v46, %v1420_v7  ;;  %1449 = vadd.xlane.f32.xlu0 %v1441_v28  ;;  %v1442_v9 = vmul.f32 %v3786_v29, %v3786_v29  ;;  %v3791_v35 = vmul.f32 %v3382_v16, %v1427_v54  ;;  %v1421_v59 = vmul.f32 0.05, %v1410_v56  ;;  %v2793_v46 = vld [vmem:[#allocation7 + $0x90] sm:$0xff]  }
 0x75b   :  { %v1412_v50 = vpop.xlane.xlu1 %1411  ;;  %2701 = vmatpush3.bf16.msra.mxu1 %v2793_v46  ;;  %v2375_v28 = vld [vmem:[#allocation2 + $0x2] ss:$0 sm:$0xff] }
 0x75c   :  { %1451 = vadd.xlane.f32.xlu1 %v1442_v9  ;;  %v1443_v3 = vmul.f32 %v3791_v35, %v3791_v35  ;;  %v3796_v36 = vmul.f32 %v3382_v16, %v1428_v44  ;;  %v1429_v20 = vsub.f32 %v1397_v43, %v1421_v59  ;;  %v1422_v6 = vmul.f32 0.05, %v1412_v50  ;;  %2702 = vmatprep.subr.bf16.mxu1 %v3131_v15 }
 0x75d   :  { %v1414_v38 = vpop.xlane.xlu0 %1413 }
 0x75e   :  { %1453 = vadd.xlane.f32.xlu0 %v1443_v3  ;;  %v1444_v39 = vmul.f32 %v3796_v36, %v3796_v36  ;;  %v1430_v10 = vsub.f32 %v1398_v21, %v1422_v6  ;;  %v1423_v40 = vmul.f32 0.05, %v1414_v38  ;;  %v3801_v13 = vmul.f32 %v3382_v16, %v1429_v20 }
 0x75f   :  { %v1416_v45 = vpop.xlane.xlu1 %1415 }
 0x760   :  { %1455 = vadd.xlane.f32.xlu1 %v1444_v39  ;;  %v1431_v47 = vsub.f32 %v1399_v52, %v1423_v40  ;;  %v1424_v0 = vmul.f32 0.05, %v1416_v45  ;;  %v1445_v24 = vmul.f32 %v3801_v13, %v3801_v13  ;;  %v3806_v23 = vmul.f32 %v3382_v16, %v1430_v10  ;;  %v2376_v39 = vld [vmem:[#allocation4 + $0x2] ss:$0 sm:$0xff] }
 0x762   :  { %v1432_v55 = vsub.f32 %v3774_v48, %v1424_v0  ;;  %1457 = vadd.xlane.f32.xlu0 %v1445_v24  ;;  %v1446_v33 = vmul.f32 %v3806_v23, %v3806_v23  ;;  %v3812_v41 = vmul.f32 %v3382_v16, %v1431_v47 }
 0x764   :  { %1459 = vadd.xlane.f32.xlu1 %v1446_v33  ;;  %v1447_v58 = vmul.f32 %v3812_v41, %v3812_v41  ;;  %v3817_v60 = vmul.f32 %v3382_v16, %v1432_v55  ;;  %v2786_v16 = vld [vmem:[%s3961_s4 + $0x98] sm:$0xff]  }
 0x765   :  { %2678 = vmatprep.subr.bf16.mxu0 %v2786_v16 }
 0x766   :  { %1461 = vadd.xlane.f32.xlu0 %v1447_v58  ;;  %v1448_v63 = vmul.f32 %v3817_v60, %v3817_v60  ;;  %2679 = vmatpush3.bf16.msra.mxu0 %v2786_v16 }
 0x767   :  { %2680 = vmatprep.subr.bf16.mxu0 %v2787_v42 }
 0x768   :  { %1463 = vadd.xlane.f32.xlu1 %v1448_v63 }
 0x76a   :  { %2681 = vmatpush3.bf16.msra.mxu0 %v2787_v42 }
 0x76b   :  { %2682 = vmatprep.subr.bf16.mxu0 %v2788_v61 }
 0x76e   :  { %2683 = vmatpush3.bf16.msra.mxu0 %v2788_v61 }
 0x76f   :  { %2684 = vmatprep.subr.bf16.mxu0 %v2789_v30 }
 0x772   :  { %2685 = vmatpush3.bf16.msra.mxu0 %v2789_v30 }
 0x773   :  { %2686 = vmatprep.subr.bf16.mxu0 %v2790_v34 }
 0x776   :  { %2687 = vmatpush3.bf16.msra.mxu0 %v2790_v34 }
 0x7e7   :  { %v1450_v17 = vpop.xlane.xlu0 %1449 }
 0x7e8   :  { %v1465_v62 = vmul.f32 0.05, %v1450_v17 }
 0x7e9   :  { %v1452_v11 = vpop.xlane.xlu1 %1451 }
 0x7ea   :  { %v1473_v43 = vadd.f32 1e-05, %v1465_v62  ;;  %v1466_v19 = vmul.f32 0.05, %v1452_v11 }
 0x7eb   :  { %v1454_v53 = vpop.xlane.xlu0 %1453 }
 0x7ec   :  { %2911 = vrsqrt.f32 %v1473_v43  ;;  %v1474_v21 = vadd.f32 1e-05, %v1466_v19  ;;  %v1467_v8 = vmul.f32 0.05, %v1454_v53  ;;  %v2794_v19 = vld [vmem:[#allocation7 + $0x98] sm:$0xff]   ;;  %v2796_v53 = vld [vmem:[#allocation7 + $0xa8] sm:$0xff]  }
 0x7ed   :  { %v1456_v52 = vpop.xlane.xlu1 %1455  ;;  %2703 = vmatpush3.bf16.msra.mxu1 %v2794_v19  ;;  %v2831_v19 = vld [vmem:[#allocation12 + $0x60] sm:$0xff]  }
 0x7ee   :  { %2913 = vrsqrt.f32 %v1474_v21  ;;  %v1475_v27 = vadd.f32 1e-05, %v1467_v8  ;;  %v1468_v51 = vmul.f32 0.05, %v1456_v52  ;;  %2704 = vmatprep.subr.bf16.mxu1 %v3131_v15  ;;  %v2798_v21 = vld [vmem:[#allocation7 + $0xb8] sm:$0xff]  }
 0x7ef   :  { %v1458_v31 = vpop.xlane.xlu0 %1457  ;;  %v1692_v8 = vld [vmem:[#allocation6 + $0x2] sm:$0x1] }
 0x7f0   :  { %2915 = vrsqrt.f32 %v1475_v27  ;;  %v1476_v57 = vadd.f32 1e-05, %v1468_v51  ;;  %v1469_v12 = vmul.f32 0.05, %v1458_v31  ;;  %v1697_v52 = vrot.slane %v1692_v8, %v3485_v18 }
 0x7f1   :  { %v1460_v4 = vpop.xlane.xlu1 %1459  ;;  %v1707_v27 = vmul.f32 %v1692_v8, %v1692_v8 }
 0x7f2   :  { %2917 = vrsqrt.f32 %v1476_v57  ;;  %v1477_v2 = vadd.f32 1e-05, %v1469_v12  ;;  %v1470_v49 = vmul.f32 0.05, %v1460_v4 }
 0x7f3   :  { %v1462_v32 = vpop.xlane.xlu0 %1461 }
 0x7f4   :  { %2919 = vrsqrt.f32 %v1477_v2  ;;  %v1478_v25 = vadd.f32 1e-05, %v1470_v49  ;;  %v1471_v54 = vmul.f32 0.05, %v1462_v32  ;;  %v1712_v2 = vrot.slane %v1707_v27, %v3485_v18 }
 0x7f5   :  { %v1464_v44 = vpop.xlane.xlu1 %1463 }
 0x7f6   :  { %v2912_v7 = vpop.eup %2911  ;;  %2921 = vrsqrt.f32 %v1478_v25  ;;  %v1479_v56 = vadd.f32 1e-05, %v1471_v54  ;;  %v1472_v9 = vmul.f32 0.05, %v1464_v44 }
 0x7f7   :  { %v1489_v59 = vmul.f32 %v2912_v7, %v3781_v22 }
 0x7f8   :  { %v2914_v50 = vpop.eup %2913  ;;  %2923 = vrsqrt.f32 %v1479_v56  ;;  %v1480_v3 = vadd.f32 1e-05, %v1472_v9 }
 0x7f9   :  { %v1490_v20 = vmul.f32 %v2914_v50, %v3786_v29  ;;  %v1505_v6 = vmul.f32 %v2375_v28, %v1489_v59 }
 0x7fa   :  { %v2916_v38 = vpop.eup %2915  ;;  %2925 = vrsqrt.f32 %v1480_v3 }
 0x7fb   :  { %v1491_v10 = vmul.f32 %v2916_v38, %v3791_v35  ;;  %v1506_v40 = vmul.f32 %v2375_v28, %v1490_v20  ;;  %v1521_v24 = vadd.f32 %v2376_v39, %v1505_v6 }
 0x7fc   :  { %v2918_v45 = vpop.eup %2917 }
 0x7fd   :  { %v1507_v47 = vmul.f32 %v2375_v28, %v1491_v10  ;;  %v1492_v0 = vmul.f32 %v2918_v45, %v3796_v36  ;;  %v1522_v55 = vadd.f32 %v2376_v39, %v1506_v40 }
 0x7fe   :  { %v2920_v33 = vpop.eup %2919 }
 0x7ff   :  { %v1508_v22 = vmul.f32 %v2375_v28, %v1492_v0  ;;  %v2472_v58 = vpack.c.bf16 %v1522_v55, %v1521_v24  ;;  %v1493_v63 = vmul.f32 %v2920_v33, %v3801_v13  ;;  %v1523_v29 = vadd.f32 %v2376_v39, %v1507_v47  ;;  %v2801_v0 = vld [vmem:[%s3964_s7 + $0x4] ss:$8 sps:$4 sm:$0xff]   ;;  %v2799_v24 = vld [vmem:[%s3964_s7] ss:$8 sps:$4 sm:$0xff]   ;;  %v2804_v55 = vld [vmem:[%s3964_s7 + $0x14] ss:$8 sps:$4 sm:$0xff]  }
 0x800   :  { %v2922_v37 = vpop.eup %2921  ;;  %1961 = vmatprep.subr.bf16.mxu0 %v2801_v0  ;;  %v2802_v33 = vld [vmem:[%s3964_s7 + $0x10] ss:$8 sps:$4 sm:$0xff]  }
 0x801   :  { %2688 = vmatprep.mubr.bf16.mxu0 %v2472_v58  ;;  %v1524_v5 = vadd.f32 %v2376_v39, %v1508_v22  ;;  %v1494_v16 = vmul.f32 %v2922_v37, %v3806_v23  ;;  %v1509_v35 = vmul.f32 %v2375_v28, %v1493_v63  ;;  %v2807_v22 = vld [vmem:[%s3964_s7 + $0x24] ss:$8 sps:$4 sm:$0xff]   ;;  %v2805_v58 = vld [vmem:[%s3964_s7 + $0x20] ss:$8 sps:$4 sm:$0xff]   ;;  %v2810_v63 = vld [vmem:[%s3964_s7 + $0x34] ss:$8 sps:$4 sm:$0xff]  }
 0x802   :  { %v2924_v42 = vpop.eup %2923  ;;  %v2808_v37 = vld [vmem:[%s3964_s7 + $0x30] ss:$8 sps:$4 sm:$0xff]  }
 0x803   :  { %v2473_v61 = vpack.c.bf16 %v1524_v5, %v1523_v29  ;;  %v1510_v30 = vmul.f32 %v2375_v28, %v1494_v16  ;;  %v1495_v34 = vmul.f32 %v2924_v42, %v3812_v41  ;;  %v1525_v1 = vadd.f32 %v2376_v39, %v1509_v35  ;;  %v2795_v41 = vld [vmem:[#allocation7 + $0xa0] sm:$0xff]   ;;  %v2811_v5 = vld [vmem:[%s3964_s7 + $0x40] ss:$8 sps:$4 sm:$0xff]   ;;  %v2816_v16 = vld [vmem:[%s3964_s7 + $0x54] ss:$8 sps:$4 sm:$0xff]  }
 0x804   :  { %v2926_v36 = vpop.eup %2925  ;;  %2705 = vmatpush3.bf16.msra.mxu1 %v2795_v41  ;;  %v2813_v29 = vld [vmem:[%s3964_s7 + $0x44] ss:$8 sps:$4 sm:$0xff]   ;;  %v2814_v35 = vld [vmem:[%s3964_s7 + $0x50] ss:$8 sps:$4 sm:$0xff]  }
 0x805   :  { %2689 = vmatmul.mubr.bf16.vlgmr.msra.gmra.mrb[16].mxu0 %v2473_v61  ;;  %v1526_v26 = vadd.f32 %v2376_v39, %v1510_v30  ;;  %v1496_v46 = vmul.f32 %v2926_v36, %v3817_v60  ;;  %v1511_v17 = vmul.f32 %v2375_v28, %v1495_v34  ;;  %2706 = vmatprep.subr.bf16.mxu1 %v3131_v15  ;;  %v2797_v60 = vld [vmem:[#allocation7 + $0xb0] sm:$0xff]   ;;  %v2819_v42 = vld [vmem:[%s3964_s7 + $0x64] ss:$8 sps:$4 sm:$0xff]   ;;  %v2820_v34 = vld [vmem:[%s3964_s7 + $0x70] ss:$8 sps:$4 sm:$0xff]   ;;  %v3133_v36 = vmov 0  }
 0x806   :  { %1962 = vmatpush1.bf16.msra.mxu0 %v2799_v24  ;;  %v2817_v61 = vld [vmem:[%s3964_s7 + $0x60] ss:$8 sps:$4 sm:$0xff]   ;;  %v2822_v30 = vld [vmem:[%s3964_s7 + $0x74] ss:$8 sps:$4 sm:$0xff]  }
 0x807   :  { %v2474_v13 = vpack.c.bf16 %v1526_v26, %v1525_v1  ;;  %v1512_v62 = vmul.f32 %v2375_v28, %v1496_v46  ;;  %v1527_v11 = vadd.f32 %v2376_v39, %v1511_v17  ;;  %v1718_v28 = vmul.f32 %v1707_v27, %v1707_v27  ;;  %1963 = vmatprep.subr.bf16.mxu0 %v2804_v55  ;;  %v2823_v1 = vld [vmem:[#allocation12 + $0x40] sm:$0xff]   ;;  %v2825_v46 = vld [vmem:[#allocation12 + $0x48] sm:$0xff]  }
 0x808   :  { %2707 = vmatpush3.bf16.msra.mxu1 %v2796_v53  ;;  %v2824_v26 = vld [vmem:[#allocation12] sm:$0xff]   ;;  %v2826_v17 = vld [vmem:[#allocation12 + $0x8] sm:$0xff]  }
 0x809   :  { %2692 = vmatprep.mubr.bf16.mxu0 %v2474_v13  ;;  %v3853_v43 = vadd.f32 %v2376_v39, %v1512_v62  ;;  %2708 = vmatprep.subr.bf16.mxu1 %v3131_v15  ;;  %v1723_v6 = vrot.slane %v1718_v28, %v3485_v18  ;;  %v2827_v13 = vld [vmem:[#allocation12 + $0x50] sm:$0xff]   ;;  %v2832_v41 = vld [vmem:[#allocation12 + $0x20] sm:$0xff]   ;;  %v2833_v53 = vld [vmem:[#allocation12 + $0x68] sm:$0xff]  }
 0x80a   :  { %1964 = vmatpush1.bf16.msra.mxu0 %v2802_v33  ;;  %v2828_v62 = vld [vmem:[#allocation12 + $0x10] sm:$0xff]  }
 0x80b   :  { %v2475_v23 = vpack.c.bf16 %v3853_v43, %v1527_v11  ;;  %1965 = vmatprep.subr.bf16.mxu0 %v2807_v22  ;;  %v2829_v11 = vld [vmem:[#allocation12 + $0x58] sm:$0xff]  }
 0x80c   :  { %2709 = vmatpush3.bf16.msra.mxu1 %v2797_v60  ;;  %v2834_v60 = vld [vmem:[#allocation12 + $0x28] sm:$0xff]  }
 0x80d   :  { %2693 = vmatmul.mubr.bf16.gmra.mrb[20].mxu0 %v2475_v23  ;;  %2710 = vmatprep.subr.bf16.mxu1 %v3131_v15  ;;  %v2830_v23 = vld [vmem:[#allocation12 + $0x18] sm:$0xff]  }
 0x80e   :  { %1966 = vmatpush1.bf16.msra.mxu0 %v2805_v58  ;;  %1993 = vmatprep.mubr.bf16.mxu0 %v3133_v36 }
 0x80f   :  { %1967 = vmatprep.subr.bf16.mxu0 %v2810_v63 }
 0x810   :  { %2711 = vmatpush3.bf16.msra.mxu1 %v2798_v21  ;;  %v2405_v21 = vld [vmem:[#allocation9 + $0x2] ss:$0 sm:$0xff] }
 0x811   :  { %2545 = vmatprep.subr.bf16.mxu1 %v2823_v1  ;;  %v1753_v8 = vmul.f32 %v2405_v21, %v3853_v43  ;;  %v2835_v43 = vld [vmem:[#allocation12 + $0x70] sm:$0xff]  }
 0x812   :  { %1968 = vmatpush1.bf16.msra.mxu0 %v2808_v37 }
 0x813   :  { %1969 = vmatprep.subr.bf16.mxu0 %v2813_v29 }
 0x816   :  { %1970 = vmatpush1.bf16.msra.mxu0 %v2811_v5 }
 0x817   :  { %1971 = vmatprep.subr.bf16.mxu0 %v2816_v16  ;;  %v2845_v16 = vld [vmem:[%s3968_s11 + $0x30] sm:$0xff]  }
 0x81a   :  { %1972 = vmatpush1.bf16.msra.mxu0 %v2814_v35  ;;  %v2430_v35 = vld [vmem:[%s3967_s10] ss:$0 sm:$0xff] }
 0x81b   :  { %1973 = vmatprep.subr.bf16.mxu0 %v2819_v42 }
 0x81e   :  { %1974 = vmatpush1.bf16.msra.mxu0 %v2817_v61 }
 0x81f   :  { %1975 = vmatprep.subr.bf16.mxu0 %v2822_v30 }
 0x822   :  { %1976 = vmatpush1.bf16.msra.mxu0 %v2820_v34 }
 0x823   :  { %2716 = vmatprep.subr.bf16.mxu0 %v3131_v15 }
 0x8d8   :  { %v2690_v51 = vpop.f32.mrb[16].mxu0 }
 0x8d9   :  { %v1700_v57 = vmul.f32 %v2690_v51, %v1697_v52  ;;  %v1660_v31 = vpop.f32.mrb[17].mxu0 }
 0x8da   :  { %v1699_v12 = vmul.f32 %v1697_v52, %v1660_v31  ;;  %v2691_v4 = vpop.f32.mrb[18].mxu0 }
 0x8db   :  { %v1704_v49 = vadd.f32 %v2691_v4, %v1700_v57  ;;  %v1663_v32 = vpop.f32.mrb[19].mxu0 }
 0x8dc   :  { %v1703_v25 = vadd.f32 %v1699_v12, %v1663_v32 }
 0x8de   :  { %v1714_v54 = vmul.f32 %v1712_v2, %v1703_v25 }
 0x8e0   :  { %v1716_v7 = vadd.f32 %v1714_v54, %v1704_v49  ;;  %v2694_v44 = vpop.f32.mrb[20].mxu0 }
 0x8e1   :  { %v1702_v56 = vmul.f32 %v2694_v44, %v1697_v52  ;;  %v1676_v9 = vpop.f32.mrb[21].mxu0 }
 0x8e2   :  { %v1701_v59 = vmul.f32 %v1697_v52, %v1676_v9  ;;  %v2695_v50 = vpop.f32.mrb[22].mxu0  ;;  %v1725_v10 = vmul.f32 %v1723_v6, %v1716_v7  ;;  %v2836_v9 = vld [vmem:[#allocation12 + $0x30] sm:$0xff]   ;;  %v2842_v6 = vld [vmem:[%s3968_s11 + $0x18] sm:$0xff]  }
 0x8e3   :  { %v1706_v3 = vadd.f32 %v2695_v50, %v1702_v56  ;;  %v1679_v20 = vpop.f32.mrb[23].mxu0  ;;  %v2838_v50 = vld [vmem:[#allocation12 + $0x38] sm:$0xff]  }
 0x8e4   :  { %v1705_v38 = vadd.f32 %v1701_v59, %v1679_v20  ;;  %v2837_v59 = vld [vmem:[#allocation12 + $0x78] sm:$0xff]  }
 0x8e5   :  { %v2841_v20 = vld [vmem:[%s3968_s11 + $0x10] sm:$0xff]  }
 0x8e6   :  { %v1715_v39 = vmul.f32 %v1712_v2, %v1705_v38  ;;  %v2843_v38 = vld [vmem:[%s3968_s11 + $0x20] sm:$0xff]  }
 0x8e8   :  { %v1717_v40 = vadd.f32 %v1715_v39, %v1706_v3  ;;  %v2839_v3 = vld [vmem:[%s3968_s11] sm:$0xff]   ;;  %v2844_v39 = vld [vmem:[%s3968_s11 + $0x28] sm:$0xff]  }
 0x8ea   :  { %v1726_v45 = vadd.f32 %v1725_v10, %v1717_v40  ;;  %v1869_v10 = vld [vmem:[#allocation10] sm:$0x3]  ;;  %v1877_v40 = vsub.s32 1, %v3482_v14  ;;  %v2846_v14 = vld [vmem:[%s3968_s11 + $0x38] sm:$0xff]  }
 0x8ec   :  { %v1727_v47 = vpack.c.bf16 %v1726_v45, %v1726_v45  ;;  %v1874_v45 = vrot.slane %v1869_v10, %v3485_v18 }
 0x8ee   :  { %2713 = vmatmul.mubr.bf16.vlgmr.msra.gmra.mrb[16].mxu1 %v1727_v47  ;;  %v1878_v47 = vrot.slane %v1869_v10, %v1877_v40 }
 0x8ef   :  { %2546 = vmatpush3.bf16.msra.mxu1 %v2824_v26 }
 0x8f0   :  { %2547 = vmatprep.subr.bf16.mxu1 %v2825_v46  ;;  %v2447_v46 = vld [vmem:[#allocation13] ss:$0 sm:$0xff] }
 0x8f3   :  { %2548 = vmatpush3.bf16.msra.mxu1 %v2826_v17 }
 0x8f4   :  { %2549 = vmatprep.subr.bf16.mxu1 %v2827_v13 }
 0x8f7   :  { %2550 = vmatpush3.bf16.msra.mxu1 %v2828_v62 }
 0x8f8   :  { %2551 = vmatprep.subr.bf16.mxu1 %v2829_v11 }
 0x8fb   :  { %2552 = vmatpush3.bf16.msra.mxu1 %v2830_v23 }
 0x8fc   :  { %2553 = vmatprep.subr.bf16.mxu1 %v2831_v19 }
 0x8ff   :  { %2554 = vmatpush3.bf16.msra.mxu1 %v2832_v41 }
 0x900   :  { %2555 = vmatprep.subr.bf16.mxu1 %v2833_v53 }
 0x903   :  { %2556 = vmatpush3.bf16.msra.mxu1 %v2834_v60 }
 0x904   :  { %2557 = vmatprep.subr.bf16.mxu1 %v2835_v43 }
 0x907   :  { %2558 = vmatpush3.bf16.msra.mxu1 %v2836_v9 }
 0x908   :  { %2559 = vmatprep.subr.bf16.mxu1 %v2837_v59 }
 0x90b   :  { %2560 = vmatpush3.bf16.msra.mxu1 %v2838_v50 }
 0x9c1   :  { %v1836_v52 = vpop.f32.mrb[16].mxu1 }
 0x9c2   :  { %v1837_v27 = vadd.f32 %v1836_v52, %v1753_v8  ;;  %v2714_v51 = vpop.f32.mrb[17].mxu1 }
 0x9c3   :  { %v1839_v57 = vpop.f32.mrb[18].mxu1 }
 0x9c4   :  { %v1842_v31 = vmul.f32 %v1837_v27, %v1837_v27  ;;  %v2715_v12 = vpop.f32.mrb[19].mxu1 }
 0x9c6   :  { %v1843_v4 = vmul.f32 %v1842_v31, %v1837_v27 }
 0x9c8   :  { %v1844_v2 = vmul.f32 0.044715, %v1843_v4 }
 0x9ca   :  { %v1845_v49 = vadd.f32 %v1844_v2, %v1837_v27 }
 0x9cc   :  { %v1846_v32 = vmul.f32 0.7978846, %v1845_v49 }
 0x9ce   :  { %2927 = vtanh.f32 %v1846_v32 }
 0x9d8   :  { %v2928_v25 = vpop.eup %2927 }
 0x9d9   :  { %v1848_v54 = vadd.f32 1.0, %v2928_v25 }
 0x9db   :  { %v1849_v7 = vmul.f32 0.5, %v1848_v54 }
 0x9dd   :  { %v1850_v28 = vmul.f32 %v1849_v7, %v1837_v27 }
 0x9df   :  { %v1851_v44 = vadd.f32 %v1850_v28, %v3774_v48  ;;  %v2840_v48 = vld [vmem:[%s3968_s11 + $0x8] sm:$0xff]  }
 0x9e1   :  { %v1852_v56 = vpack.c.bf16 %v1851_v44, %v1851_v44 }
 0x9e3   :  { %1994 = vmatmul.mubr.bf16.vlgmr.msra.gmra.mrb[24].mxu0 %v1852_v56 }
 0x9e4   :  { %2732 = vmatprep.mubr.msk.bf16.mxu0 %vm3132_vm1, %v3131_v15  ;;  %2717 = vmatpush3.bf16.msra.mxu0 %v2839_v3 }
 0x9e5   :  { %2718 = vmatprep.subr.bf16.mxu0 %v3131_v15 }
 0x9e8   :  { %2719 = vmatpush3.bf16.msra.mxu0 %v2840_v48 }
 0x9e9   :  { %2720 = vmatprep.subr.bf16.mxu0 %v3131_v15 }
 0x9ec   :  { %2721 = vmatpush3.bf16.msra.mxu0 %v2841_v20 }
 0x9ed   :  { %2722 = vmatprep.subr.bf16.mxu0 %v3131_v15 }
 0x9f0   :  { %2723 = vmatpush3.bf16.msra.mxu0 %v2842_v6 }
 0x9f1   :  { %2724 = vmatprep.subr.bf16.mxu0 %v3131_v15 }
 0x9f4   :  { %2725 = vmatpush3.bf16.msra.mxu0 %v2843_v38 }
 0x9f5   :  { %2726 = vmatprep.subr.bf16.mxu0 %v3131_v15 }
 0x9f8   :  { %2727 = vmatpush3.bf16.msra.mxu0 %v2844_v39 }
 0x9f9   :  { %2728 = vmatprep.subr.bf16.mxu0 %v3131_v15 }
 0x9fc   :  { %2729 = vmatpush3.bf16.msra.mxu0 %v2845_v16 }
 0x9fd   :  { %2730 = vmatprep.subr.bf16.mxu0 %v3131_v15 }
 0xa00   :  { %2731 = vmatpush3.bf16.msra.mxu0 %v2846_v14 }
 0xab6   :  { %v1995_v0 = vpop.f32.mrb[24].mxu0 }
 0xab7   :  { %v1996_v24 = vadd.f32 %v1995_v0, %v1874_v45  ;;  %v1997_v55 = vpop.f32.mrb[25].mxu0 }
 0xab8   :  { %v1998_v33 = vadd.f32 %v1997_v55, %v1878_v47  ;;  %v1999_v22 = vpop.f32.mrb[26].mxu0 }
 0xab9   :  { %v2002_v58 = vmax.f32 %v1996_v24, 0.0  ;;  %v2000_v63 = vpop.f32.mrb[27].mxu0 }
 0xaba   :  { %v2003_v37 = vmax.f32 %v1998_v33, 0.0 }
 0xabb   :  { %v2004_v5 = vpack.c.bf16 %v2002_v58, %v2002_v58 }
 0xabc   :  { %v2005_v29 = vpack.c.bf16 %v2003_v37, %v2003_v37 }
 0xabe   :  { %2173 = vmatprep.mubr.bf16.mxu1 %v2005_v29 }
 0xabf   :  { %2174 = vmatmul.mubr.bf16.vlgmr.msra.gmra.mrb[20].mxu1 %v2004_v5 }
 0xb92   :  { %v2561_v18 = vpop.f32.mrb[20].mxu1 }
 0xb93   :  { %v2562_v42 = vpop.f32.mrb[21].mxu1 }
 0xb94   :  { %v2563_v61 = vadd.f32 %v2562_v42, %v2561_v18  ;;  %v2564_v30 = vpop.f32.mrb[22].mxu1 }
 0xb95   :  { %v2565_v34 = vpop.f32.mrb[23].mxu1 }
 0xb96   :  { %v2176_v36 = vadd.f32 %v2563_v61, %v2430_v35 }
 0xb98   :  { %v2181_v1 = vmax.f32 %v2176_v36, 0.0 }
 0xb9a   :  { %v2182_v26 = vpack.c.bf16 %v2181_v1, %v2181_v1 }
 0xb9c   :  { %2733 = vmatmul.mubr.bf16.vlgmr.msra.gmra.mrb[28].mxu0 %v2182_v26 }
 0xc6f   :  { %v2288_v15 = vpop.f32.mrb[28].mxu0 }
 0xc70   :  { %v2289_v17 = vadd.f32 %v2447_v46, %v2288_v15  ;;  %v2734_v13 = vpop.f32.mrb[29].mxu0 }
 0xc71   :  { %v2291_v62 = vpop.f32.mrb[30].mxu0 }
 0xc72   :  { %2294 = vst [vmem:[%s3970_s13] sm:$0xff] %v2289_v17  ;;  %v2735_v11 = vpop.f32.mrb[31].mxu0 }
 0xc73   :  { %2299 = vsyncpa [#allocation3], 1 }
 0xc74   :  { %2300 = vsyncpa [#allocation5], 1 }
 0xc75   :  { %2301 = vsyncpa [#allocation8], 1 }
 0xc76   :  { %2302 = vsyncpa [#allocation11], 1 }
 0xc77   :  { %2303 = vsyncpa [#allocation14], 1 }

</bundles_post_ra>
